<compile_context>
chip_gen: v5e
topology: v5e:2x2
jax: 0.10.0
libtpu: 0.0.40
codegen_flags: <defaults>
</compile_context>

<pallas_src>
import functools

import jax
import jax.numpy as jnp
from jax.experimental import pallas as pl
from jax.experimental.pallas import tpu as pltpu


def _round_up(v: int, m: int) -> int:
    return (v + m - 1) // m * m


def _fused_graphsage_kernel(a_ref, x_ref, w_ref, b_ref, o_ref, h_ref, cat_ref,
                            *, num_layers: int, c_pad: int):
    """All SAGEConv layers in one kernel (everything resident in VMEM).

    a_ref:   [Np, Np]        bf16  row-normalized dense adjacency (A * 1/deg)
    x_ref:   [Np, Cp]        bf16  zero-padded node features
    w_ref:   [L, 2*Cp, Cp]   bf16  per-layer fused weights [[W_l], [W_r]]
    b_ref:   [L, 1, Cp]      f32   per-layer bias (lin_l bias only, PyG-style)
    o_ref:   [Np, Cp]        f32   final-layer output (sliced to logical size outside)
    h_ref:   [Np, Cp]        bf16  scratch: current activations
    cat_ref: [Np, 2*Cp]      bf16  scratch: [mean-agg | self] concatenation
    """
    h_ref[...] = x_ref[...]
    a = a_ref[...]                                   # adjacency loaded once, reused
    for layer in range(num_layers):                  # static unroll (weights indexed statically)
        h = h_ref[...]
        # Mean aggregation: A_norm @ h (deg_inv already folded into A host-side).
        agg = jnp.dot(a, h, preferred_element_type=jnp.float32)
        # Single fused projection: [agg | h] @ [[W_l],[W_r]]  (one MXU matmul, K = 2*Cp).
        cat_ref[:, :c_pad] = agg.astype(jnp.bfloat16)
        cat_ref[:, c_pad:] = h
        out = jnp.dot(cat_ref[...], w_ref[layer],
                      preferred_element_type=jnp.float32)
        out = out + b_ref[layer]
        if layer < num_layers - 1:
            out = jnp.maximum(out, 0.0)              # ReLU; dropout == identity (eval)
            h_ref[...] = out.astype(jnp.bfloat16)
        else:
            o_ref[...] = out


def build_dense_graph(edge_index, num_nodes, num_nodes_pad):
    """Glue (plain JAX): edge list -> row-normalized, zero-padded dense adjacency."""
    src = edge_index[0]
    dst = edge_index[1]
    a = jnp.zeros((num_nodes, num_nodes), jnp.float32)
    # .add keeps multiplicity, matching scatter-mean over duplicate edges.
    a = a.at[dst, src].add(1.0)
    deg = jnp.sum(a, axis=1, keepdims=True)
    a_norm = a / jnp.maximum(deg, 1.0)               # fold 1/deg into A (row scale)
    a_norm = jnp.pad(a_norm, ((0, num_nodes_pad - num_nodes),
                              (0, num_nodes_pad - num_nodes)))
    return a_norm.astype(jnp.bfloat16)


def init_graphsage_params(key, in_channels, hidden_channels, out_channels,
                          num_layers=5):
    """Deterministic synthetic parameters matching the module's layer shapes."""
    sizes = ([(in_channels, hidden_channels)]
             + [(hidden_channels, hidden_channels)] * (num_layers - 2)
             + [(hidden_channels, out_channels)])
    params = []
    for (c_in, c_out) in sizes:
        key, k1, k2, k3 = jax.random.split(key, 4)
        scale = 1.0 / jnp.sqrt(jnp.float32(c_in))
        w_l = jax.random.uniform(k1, (c_in, c_out), jnp.float32, -scale, scale)
        b_l = jax.random.uniform(k2, (1, c_out), jnp.float32, -scale, scale)
        w_r = jax.random.uniform(k3, (c_in, c_out), jnp.float32, -scale, scale)
        params.append((w_l, b_l, w_r))
    return params


def _pack_params(params, c_pad):
    """Zero-pad every layer's weights/bias to [2*Cp, Cp] / [1, Cp] and stack."""
    w_all, b_all = [], []
    for (w_l, b_l, w_r) in params:
        c_in, c_out = w_l.shape
        w_l_p = jnp.pad(w_l, ((0, c_pad - c_in), (0, c_pad - c_out)))
        w_r_p = jnp.pad(w_r, ((0, c_pad - c_in), (0, c_pad - c_out)))
        b_p = jnp.pad(b_l, ((0, 0), (0, c_pad - c_out)))
        w_all.append(jnp.concatenate([w_l_p, w_r_p], axis=0))   # [2*Cp, Cp]
        b_all.append(b_p)                                       # [1, Cp]
    w_all = jnp.stack(w_all, axis=0).astype(jnp.bfloat16)       # [L, 2*Cp, Cp]
    b_all = jnp.stack(b_all, axis=0).astype(jnp.float32)        # [L, 1, Cp]
    return w_all, b_all


def graphsage_forward(x, edge_index, params):
    """Full GraphSAGE.forward: one fused Pallas kernel for the whole conv stack."""
    num_nodes, in_channels = x.shape
    out_channels = params[-1][0].shape[1]
    num_layers = len(params)

    # Common padded channel width so per-layer weights stack into one array.
    c_max = max(max(w.shape[0], w.shape[1]) for (w, _, _) in params)
    c_pad = _round_up(max(c_max, in_channels, out_channels), 128)
    n_pad = _round_up(num_nodes, 128)

    a_norm = build_dense_graph(edge_index, num_nodes, n_pad)
    x_pad = jnp.pad(x, ((0, n_pad - num_nodes),
                        (0, c_pad - in_channels))).astype(jnp.bfloat16)
    w_all, b_all = _pack_params(params, c_pad)

    kernel = functools.partial(_fused_graphsage_kernel,
                               num_layers=num_layers, c_pad=c_pad)
    vmem = pl.BlockSpec(memory_space=pltpu.MemorySpace.VMEM)
    out_pad = pl.pallas_call(
        kernel,
        out_shape=jax.ShapeDtypeStruct((n_pad, c_pad), jnp.float32),
        in_specs=[vmem, vmem, vmem, vmem],
        out_specs=vmem,
        scratch_shapes=[
            pltpu.VMEM((n_pad, c_pad), jnp.bfloat16),       # h (activations)
            pltpu.VMEM((n_pad, 2 * c_pad), jnp.bfloat16),   # [agg | h]
        ],
        compiler_params=pltpu.CompilerParams(
            vmem_limit_bytes=32 * 1024 * 1024),
    )(a_norm, x_pad, w_all, b_all)
    return out_pad[:num_nodes, :out_channels]


if __name__ == "__main__":
    key = jax.random.PRNGKey(0)
    kx, ke_src, ke_dst, kp = jax.random.split(key, 4)

    num_nodes = 16
    num_edges = 40
    in_channels = 8
    hidden_channels = 32
    out_channels = 16

    x = jax.random.normal(kx, (num_nodes, in_channels), jnp.float32)
    edge_index = jnp.stack([
        jax.random.randint(ke_src, (num_edges,), 0, num_nodes),
        jax.random.randint(ke_dst, (num_edges,), 0, num_nodes),
    ], axis=0)  # [2, E]

    params = init_graphsage_params(kp, in_channels, hidden_channels,
                                   out_channels, num_layers=5)

    out = graphsage_forward(x, edge_index, params)
    out = jax.block_until_ready(out)
    assert out.shape == (num_nodes, out_channels)
    assert bool(jnp.all(jnp.isfinite(out)))
    print("KERNEL_OK")
</pallas_src>

<mosaic_0001>
module attributes {stable_mosaic.version = 11 : i64} {
  func.func @_fused_graphsage_kernel(%arg0: memref<128x128xbf16, #tpu.memory_space<vmem>>, %arg1: memref<128x128xbf16, #tpu.memory_space<vmem>>, %arg2: memref<5x256x128xbf16, #tpu.memory_space<vmem>>, %arg3: memref<5x1x128xf32, #tpu.memory_space<vmem>>, %arg4: memref<128x128xf32, #tpu.memory_space<vmem>>, %arg5: memref<128x128xbf16, #tpu.memory_space<vmem>>, %arg6: memref<128x256xbf16, #tpu.memory_space<vmem>>) attributes {dimension_semantics = [], scalar_prefetch = 0 : i64, scratch_operands = 2 : i64, tpu.core_type = #tpu.core_type<tc>} {
    %c0 = arith.constant 0 : index
    %c0_0 = arith.constant 0 : index
    %0 = vector.load %arg1[%c0, %c0_0] : memref<128x128xbf16, #tpu.memory_space<vmem>>, vector<128x128xbf16>
    %c0_1 = arith.constant 0 : index
    %c0_2 = arith.constant 0 : index
    %1 = vector.load %arg5[%c0_1, %c0_2] : memref<128x128xbf16, #tpu.memory_space<vmem>>, vector<128x128xbf16>
    tpu.vector_store %arg5[%c0_1, %c0_2], %0 {strides = array<i32>} : memref<128x128xbf16, #tpu.memory_space<vmem>>, vector<128x128xbf16>,
    %c0_3 = arith.constant 0 : index
    %c0_4 = arith.constant 0 : index
    %2 = vector.load %arg0[%c0_3, %c0_4] : memref<128x128xbf16, #tpu.memory_space<vmem>>, vector<128x128xbf16>
    %c0_5 = arith.constant 0 : index
    %c0_6 = arith.constant 0 : index
    %3 = vector.load %arg5[%c0_5, %c0_6] : memref<128x128xbf16, #tpu.memory_space<vmem>>, vector<128x128xbf16>
    %cst = arith.constant dense<0.000000e+00> : vector<128x128xf32>
    %4 = tpu.matmul %2, %3, %cst {dimension_numbers = #tpu.dot_dimension_numbers<[1], [0], [0], [1], [0, 0, 1, 1], [], []>} : vector<128x128xbf16>, vector<128x128xbf16>, vector<128x128xf32> -> vector<128x128xf32>
    %5 = arith.truncf %4 : vector<128x128xf32> to vector<128x128xbf16>
    %c0_7 = arith.constant 0 : index
    %c0_8 = arith.constant 0 : index
    %6 = vector.load %arg6[%c0_7, %c0_8] : memref<128x256xbf16, #tpu.memory_space<vmem>>, vector<128x128xbf16>
    tpu.vector_store %arg6[%c0_7, %c0_8], %5 {strides = array<i32>} : memref<128x256xbf16, #tpu.memory_space<vmem>>, vector<128x128xbf16>,
    %c0_9 = arith.constant 0 : index
    %c128 = arith.constant 128 : index
    %7 = vector.load %arg6[%c0_9, %c128] : memref<128x256xbf16, #tpu.memory_space<vmem>>, vector<128x128xbf16>
    tpu.vector_store %arg6[%c0_9, %c128], %3 {strides = array<i32>} : memref<128x256xbf16, #tpu.memory_space<vmem>>, vector<128x128xbf16>,
    %c0_10 = arith.constant 0 : index
    %c0_11 = arith.constant 0 : index
    %8 = vector.load %arg6[%c0_10, %c0_11] : memref<128x256xbf16, #tpu.memory_space<vmem>>, vector<128x256xbf16>
    %c0_12 = arith.constant 0 : index
    %c0_13 = arith.constant 0 : index
    %c0_14 = arith.constant 0 : index
    %9 = vector.load %arg2[%c0_12, %c0_13, %c0_14] : memref<5x256x128xbf16, #tpu.memory_space<vmem>>, vector<1x256x128xbf16>
    %10 = vector.shape_cast %9 : vector<1x256x128xbf16> to vector<256x128xbf16>
    %cst_15 = arith.constant dense<0.000000e+00> : vector<128x128xf32>
    %11 = tpu.matmul %8, %10, %cst_15 {dimension_numbers = #tpu.dot_dimension_numbers<[1], [0], [0], [1], [0, 0, 1, 1], [], []>} : vector<128x256xbf16>, vector<256x128xbf16>, vector<128x128xf32> -> vector<128x128xf32>
    %c0_16 = arith.constant 0 : index
    %c0_17 = arith.constant 0 : index
    %c0_18 = arith.constant 0 : index
    %12 = vector.load %arg3[%c0_16, %c0_17, %c0_18] : memref<5x1x128xf32, #tpu.memory_space<vmem>>, vector<1x1x128xf32>
    %13 = vector.shape_cast %12 : vector<1x1x128xf32> to vector<1x128xf32>
    %14 = vector.broadcast %13 : vector<1x128xf32> to vector<128x128xf32>
    %15 = arith.addf %11, %14 : vector<128x128xf32>
    %cst_19 = arith.constant 0.000000e+00 : f32
    %16 = vector.broadcast %cst_19 : f32 to vector<128x128xf32>
    %17 = arith.maximumf %15, %16 : vector<128x128xf32>
    %18 = arith.truncf %17 : vector<128x128xf32> to vector<128x128xbf16>
    %c0_20 = arith.constant 0 : index
    %c0_21 = arith.constant 0 : index
    %19 = vector.load %arg5[%c0_20, %c0_21] : memref<128x128xbf16, #tpu.memory_space<vmem>>, vector<128x128xbf16>
    tpu.vector_store %arg5[%c0_20, %c0_21], %18 {strides = array<i32>} : memref<128x128xbf16, #tpu.memory_space<vmem>>, vector<128x128xbf16>,
    %c0_22 = arith.constant 0 : index
    %c0_23 = arith.constant 0 : index
    %20 = vector.load %arg5[%c0_22, %c0_23] : memref<128x128xbf16, #tpu.memory_space<vmem>>, vector<128x128xbf16>
    %cst_24 = arith.constant dense<0.000000e+00> : vector<128x128xf32>
    %21 = tpu.matmul %2, %20, %cst_24 {dimension_numbers = #tpu.dot_dimension_numbers<[1], [0], [0], [1], [0, 0, 1, 1], [], []>} : vector<128x128xbf16>, vector<128x128xbf16>, vector<128x128xf32> -> vector<128x128xf32>
    %22 = arith.truncf %21 : vector<128x128xf32> to vector<128x128xbf16>
    %c0_25 = arith.constant 0 : index
    %c0_26 = arith.constant 0 : index
    %23 = vector.load %arg6[%c0_25, %c0_26] : memref<128x256xbf16, #tpu.memory_space<vmem>>, vector<128x128xbf16>
    tpu.vector_store %arg6[%c0_25, %c0_26], %22 {strides = array<i32>} : memref<128x256xbf16, #tpu.memory_space<vmem>>, vector<128x128xbf16>,
    %c0_27 = arith.constant 0 : index
    %c128_28 = arith.constant 128 : index
    %24 = vector.load %arg6[%c0_27, %c128_28] : memref<128x256xbf16, #tpu.memory_space<vmem>>, vector<128x128xbf16>
    tpu.vector_store %arg6[%c0_27, %c128_28], %20 {strides = array<i32>} : memref<128x256xbf16, #tpu.memory_space<vmem>>, vector<128x128xbf16>,
    %c0_29 = arith.constant 0 : index
    %c0_30 = arith.constant 0 : index
    %25 = vector.load %arg6[%c0_29, %c0_30] : memref<128x256xbf16, #tpu.memory_space<vmem>>, vector<128x256xbf16>
    %c1 = arith.constant 1 : index
    %c0_31 = arith.constant 0 : index
    %c0_32 = arith.constant 0 : index
    %26 = vector.load %arg2[%c1, %c0_31, %c0_32] : memref<5x256x128xbf16, #tpu.memory_space<vmem>>, vector<1x256x128xbf16>
    %27 = vector.shape_cast %26 : vector<1x256x128xbf16> to vector<256x128xbf16>
    %cst_33 = arith.constant dense<0.000000e+00> : vector<128x128xf32>
    %28 = tpu.matmul %25, %27, %cst_33 {dimension_numbers = #tpu.dot_dimension_numbers<[1], [0], [0], [1], [0, 0, 1, 1], [], []>} : vector<128x256xbf16>, vector<256x128xbf16>, vector<128x128xf32> -> vector<128x128xf32>
    %c1_34 = arith.constant 1 : index
    %c0_35 = arith.constant 0 : index
    %c0_36 = arith.constant 0 : index
    %29 = vector.load %arg3[%c1_34, %c0_35, %c0_36] : memref<5x1x128xf32, #tpu.memory_space<vmem>>, vector<1x1x128xf32>
    %30 = vector.shape_cast %29 : vector<1x1x128xf32> to vector<1x128xf32>
    %31 = vector.broadcast %30 : vector<1x128xf32> to vector<128x128xf32>
    %32 = arith.addf %28, %31 : vector<128x128xf32>
    %cst_37 = arith.constant 0.000000e+00 : f32
    %33 = vector.broadcast %cst_37 : f32 to vector<128x128xf32>
    %34 = arith.maximumf %32, %33 : vector<128x128xf32>
    %35 = arith.truncf %34 : vector<128x128xf32> to vector<128x128xbf16>
    %c0_38 = arith.constant 0 : index
    %c0_39 = arith.constant 0 : index
    %36 = vector.load %arg5[%c0_38, %c0_39] : memref<128x128xbf16, #tpu.memory_space<vmem>>, vector<128x128xbf16>
    tpu.vector_store %arg5[%c0_38, %c0_39], %35 {strides = array<i32>} : memref<128x128xbf16, #tpu.memory_space<vmem>>, vector<128x128xbf16>,
    %c0_40 = arith.constant 0 : index
    %c0_41 = arith.constant 0 : index
    %37 = vector.load %arg5[%c0_40, %c0_41] : memref<128x128xbf16, #tpu.memory_space<vmem>>, vector<128x128xbf16>
    %cst_42 = arith.constant dense<0.000000e+00> : vector<128x128xf32>
    %38 = tpu.matmul %2, %37, %cst_42 {dimension_numbers = #tpu.dot_dimension_numbers<[1], [0], [0], [1], [0, 0, 1, 1], [], []>} : vector<128x128xbf16>, vector<128x128xbf16>, vector<128x128xf32> -> vector<128x128xf32>
    %39 = arith.truncf %38 : vector<128x128xf32> to vector<128x128xbf16>
    %c0_43 = arith.constant 0 : index
    %c0_44 = arith.constant 0 : index
    %40 = vector.load %arg6[%c0_43, %c0_44] : memref<128x256xbf16, #tpu.memory_space<vmem>>, vector<128x128xbf16>
    tpu.vector_store %arg6[%c0_43, %c0_44], %39 {strides = array<i32>} : memref<128x256xbf16, #tpu.memory_space<vmem>>, vector<128x128xbf16>,
    %c0_45 = arith.constant 0 : index
    %c128_46 = arith.constant 128 : index
    %41 = vector.load %arg6[%c0_45, %c128_46] : memref<128x256xbf16, #tpu.memory_space<vmem>>, vector<128x128xbf16>
    tpu.vector_store %arg6[%c0_45, %c128_46], %37 {strides = array<i32>} : memref<128x256xbf16, #tpu.memory_space<vmem>>, vector<128x128xbf16>,
    %c0_47 = arith.constant 0 : index
    %c0_48 = arith.constant 0 : index
    %42 = vector.load %arg6[%c0_47, %c0_48] : memref<128x256xbf16, #tpu.memory_space<vmem>>, vector<128x256xbf16>
    %c2 = arith.constant 2 : index
    %c0_49 = arith.constant 0 : index
    %c0_50 = arith.constant 0 : index
    %43 = vector.load %arg2[%c2, %c0_49, %c0_50] : memref<5x256x128xbf16, #tpu.memory_space<vmem>>, vector<1x256x128xbf16>
    %44 = vector.shape_cast %43 : vector<1x256x128xbf16> to vector<256x128xbf16>
    %cst_51 = arith.constant dense<0.000000e+00> : vector<128x128xf32>
    %45 = tpu.matmul %42, %44, %cst_51 {dimension_numbers = #tpu.dot_dimension_numbers<[1], [0], [0], [1], [0, 0, 1, 1], [], []>} : vector<128x256xbf16>, vector<256x128xbf16>, vector<128x128xf32> -> vector<128x128xf32>
    %c2_52 = arith.constant 2 : index
    %c0_53 = arith.constant 0 : index
    %c0_54 = arith.constant 0 : index
    %46 = vector.load %arg3[%c2_52, %c0_53, %c0_54] : memref<5x1x128xf32, #tpu.memory_space<vmem>>, vector<1x1x128xf32>
    %47 = vector.shape_cast %46 : vector<1x1x128xf32> to vector<1x128xf32>
    %48 = vector.broadcast %47 : vector<1x128xf32> to vector<128x128xf32>
    %49 = arith.addf %45, %48 : vector<128x128xf32>
    %cst_55 = arith.constant 0.000000e+00 : f32
    %50 = vector.broadcast %cst_55 : f32 to vector<128x128xf32>
    %51 = arith.maximumf %49, %50 : vector<128x128xf32>
    %52 = arith.truncf %51 : vector<128x128xf32> to vector<128x128xbf16>
    %c0_56 = arith.constant 0 : index
    %c0_57 = arith.constant 0 : index
    %53 = vector.load %arg5[%c0_56, %c0_57] : memref<128x128xbf16, #tpu.memory_space<vmem>>, vector<128x128xbf16>
    tpu.vector_store %arg5[%c0_56, %c0_57], %52 {strides = array<i32>} : memref<128x128xbf16, #tpu.memory_space<vmem>>, vector<128x128xbf16>,
    %c0_58 = arith.constant 0 : index
    %c0_59 = arith.constant 0 : index
    %54 = vector.load %arg5[%c0_58, %c0_59] : memref<128x128xbf16, #tpu.memory_space<vmem>>, vector<128x128xbf16>
    %cst_60 = arith.constant dense<0.000000e+00> : vector<128x128xf32>
    %55 = tpu.matmul %2, %54, %cst_60 {dimension_numbers = #tpu.dot_dimension_numbers<[1], [0], [0], [1], [0, 0, 1, 1], [], []>} : vector<128x128xbf16>, vector<128x128xbf16>, vector<128x128xf32> -> vector<128x128xf32>
    %56 = arith.truncf %55 : vector<128x128xf32> to vector<128x128xbf16>
    %c0_61 = arith.constant 0 : index
    %c0_62 = arith.constant 0 : index
    %57 = vector.load %arg6[%c0_61, %c0_62] : memref<128x256xbf16, #tpu.memory_space<vmem>>, vector<128x128xbf16>
    tpu.vector_store %arg6[%c0_61, %c0_62], %56 {strides = array<i32>} : memref<128x256xbf16, #tpu.memory_space<vmem>>, vector<128x128xbf16>,
    %c0_63 = arith.constant 0 : index
    %c128_64 = arith.constant 128 : index
    %58 = vector.load %arg6[%c0_63, %c128_64] : memref<128x256xbf16, #tpu.memory_space<vmem>>, vector<128x128xbf16>
    tpu.vector_store %arg6[%c0_63, %c128_64], %54 {strides = array<i32>} : memref<128x256xbf16, #tpu.memory_space<vmem>>, vector<128x128xbf16>,
    %c0_65 = arith.constant 0 : index
    %c0_66 = arith.constant 0 : index
    %59 = vector.load %arg6[%c0_65, %c0_66] : memref<128x256xbf16, #tpu.memory_space<vmem>>, vector<128x256xbf16>
    %c3 = arith.constant 3 : index
    %c0_67 = arith.constant 0 : index
    %c0_68 = arith.constant 0 : index
    %60 = vector.load %arg2[%c3, %c0_67, %c0_68] : memref<5x256x128xbf16, #tpu.memory_space<vmem>>, vector<1x256x128xbf16>
    %61 = vector.shape_cast %60 : vector<1x256x128xbf16> to vector<256x128xbf16>
    %cst_69 = arith.constant dense<0.000000e+00> : vector<128x128xf32>
    %62 = tpu.matmul %59, %61, %cst_69 {dimension_numbers = #tpu.dot_dimension_numbers<[1], [0], [0], [1], [0, 0, 1, 1], [], []>} : vector<128x256xbf16>, vector<256x128xbf16>, vector<128x128xf32> -> vector<128x128xf32>
    %c3_70 = arith.constant 3 : index
    %c0_71 = arith.constant 0 : index
    %c0_72 = arith.constant 0 : index
    %63 = vector.load %arg3[%c3_70, %c0_71, %c0_72] : memref<5x1x128xf32, #tpu.memory_space<vmem>>, vector<1x1x128xf32>
    %64 = vector.shape_cast %63 : vector<1x1x128xf32> to vector<1x128xf32>
    %65 = vector.broadcast %64 : vector<1x128xf32> to vector<128x128xf32>
    %66 = arith.addf %62, %65 : vector<128x128xf32>
    %cst_73 = arith.constant 0.000000e+00 : f32
    %67 = vector.broadcast %cst_73 : f32 to vector<128x128xf32>
    %68 = arith.maximumf %66, %67 : vector<128x128xf32>
    %69 = arith.truncf %68 : vector<128x128xf32> to vector<128x128xbf16>
    %c0_74 = arith.constant 0 : index
    %c0_75 = arith.constant 0 : index
    %70 = vector.load %arg5[%c0_74, %c0_75] : memref<128x128xbf16, #tpu.memory_space<vmem>>, vector<128x128xbf16>
    tpu.vector_store %arg5[%c0_74, %c0_75], %69 {strides = array<i32>} : memref<128x128xbf16, #tpu.memory_space<vmem>>, vector<128x128xbf16>,
    %c0_76 = arith.constant 0 : index
    %c0_77 = arith.constant 0 : index
    %71 = vector.load %arg5[%c0_76, %c0_77] : memref<128x128xbf16, #tpu.memory_space<vmem>>, vector<128x128xbf16>
    %cst_78 = arith.constant dense<0.000000e+00> : vector<128x128xf32>
    %72 = tpu.matmul %2, %71, %cst_78 {dimension_numbers = #tpu.dot_dimension_numbers<[1], [0], [0], [1], [0, 0, 1, 1], [], []>} : vector<128x128xbf16>, vector<128x128xbf16>, vector<128x128xf32> -> vector<128x128xf32>
    %73 = arith.truncf %72 : vector<128x128xf32> to vector<128x128xbf16>
    %c0_79 = arith.constant 0 : index
    %c0_80 = arith.constant 0 : index
    %74 = vector.load %arg6[%c0_79, %c0_80] : memref<128x256xbf16, #tpu.memory_space<vmem>>, vector<128x128xbf16>
    tpu.vector_store %arg6[%c0_79, %c0_80], %73 {strides = array<i32>} : memref<128x256xbf16, #tpu.memory_space<vmem>>, vector<128x128xbf16>,
    %c0_81 = arith.constant 0 : index
    %c128_82 = arith.constant 128 : index
    %75 = vector.load %arg6[%c0_81, %c128_82] : memref<128x256xbf16, #tpu.memory_space<vmem>>, vector<128x128xbf16>
    tpu.vector_store %arg6[%c0_81, %c128_82], %71 {strides = array<i32>} : memref<128x256xbf16, #tpu.memory_space<vmem>>, vector<128x128xbf16>,
    %c0_83 = arith.constant 0 : index
    %c0_84 = arith.constant 0 : index
    %76 = vector.load %arg6[%c0_83, %c0_84] : memref<128x256xbf16, #tpu.memory_space<vmem>>, vector<128x256xbf16>
    %c4 = arith.constant 4 : index
    %c0_85 = arith.constant 0 : index
    %c0_86 = arith.constant 0 : index
    %77 = vector.load %arg2[%c4, %c0_85, %c0_86] : memref<5x256x128xbf16, #tpu.memory_space<vmem>>, vector<1x256x128xbf16>
    %78 = vector.shape_cast %77 : vector<1x256x128xbf16> to vector<256x128xbf16>
    %cst_87 = arith.constant dense<0.000000e+00> : vector<128x128xf32>
    %79 = tpu.matmul %76, %78, %cst_87 {dimension_numbers = #tpu.dot_dimension_numbers<[1], [0], [0], [1], [0, 0, 1, 1], [], []>} : vector<128x256xbf16>, vector<256x128xbf16>, vector<128x128xf32> -> vector<128x128xf32>
    %c4_88 = arith.constant 4 : index
    %c0_89 = arith.constant 0 : index
    %c0_90 = arith.constant 0 : index
    %80 = vector.load %arg3[%c4_88, %c0_89, %c0_90] : memref<5x1x128xf32, #tpu.memory_space<vmem>>, vector<1x1x128xf32>
    %81 = vector.shape_cast %80 : vector<1x1x128xf32> to vector<1x128xf32>
    %82 = vector.broadcast %81 : vector<1x128xf32> to vector<128x128xf32>
    %83 = arith.addf %79, %82 : vector<128x128xf32>
    %c0_91 = arith.constant 0 : index
    %c0_92 = arith.constant 0 : index
    %84 = vector.load %arg4[%c0_91, %c0_92] : memref<128x128xf32, #tpu.memory_space<vmem>>, vector<128x128xf32>
    tpu.vector_store %arg4[%c0_91, %c0_92], %83 {strides = array<i32>} : memref<128x128xf32, #tpu.memory_space<vmem>>, vector<128x128xf32>,
    return
  }
}

</mosaic_0001>

<bundles_post_ra>
// kernel: tpu_custom_call.1
= control target key start
LH: loop header
LB: loop body
LE: loop exit
PB: predicated region body
PF: predicated region fallthrough
CT: control target
= control target key end

     0   :  { %9 = vsyncpa [#allocation5], 0  ;;  %s4466_s0 = inlined_call_operand.hbm [shape: bf16[128,128], index: 0, kind: input, shape index: {}]   ;;  %s4467_s1 = inlined_call_operand.hbm [shape: bf16[128,128], index: 1, kind: input, shape index: {}]   ;;  %s4468_s2 = inlined_call_operand.hbm [shape: bf16[5,256,128], index: 2, kind: input, shape index: {}]   ;;  %s4469_s3 = inlined_call_operand.hbm [shape: f32[5,1,128], index: 3, kind: input, shape index: {}]   ;;  %s4470_s4 = inlined_call_operand.hbm [shape: f32[128,128], index: 4, kind: output, shape index: {}]  }
   0x1   :  { %10 = vsyncpa [#allocation8], 0 }
   0x2   :  { %11 = vsyncpa [#allocation11], 0 }
   0x3   :  { %12 = vsyncpa [#allocation6], 0  ;;  %s30_s17 = sshll.u32 %s4467_s1, 4  ;;  %s4261_s18 = smov [#allocation7]   ;;  %s31_s17 = int_to_ptr.hbm [resolvable:$true] %s30_s17 }
   0x4   :  { %s32_s19 = sshll.u32 %s4261_s18, 4  ;;  %s17_s22 = sshll.u32 %s4466_s0, 4  ;;  %s33_s19 = int_to_ptr.vmem [resolvable:$true] %s32_s19  ;;  %s18_s22 = int_to_ptr.hbm [resolvable:$true] %s17_s22 }
   0x5   :  { %s4262_s23 = smov 64   ;;  %s4263_s24 = smov 4  }
   0x6   :  { %38 = dma.hbm_to_vmem [thread:$0]  %s31_s17, 1024, %s33_s19, [#allocation8], %s4262_s23, %s4262_s23, %s4263_s24  }
   0x7   :  { %s4264_s25 = smov [#allocation4]   ;;  %s43_s29 = sshll.u32 %s4468_s2, 4  ;;  %s44_s29 = int_to_ptr.hbm [resolvable:$true] %s43_s29 }
   0x8   :  { %s19_s26 = sshll.u32 %s4264_s25, 4  ;;  %s56_s5 = sshll.u32 %s4469_s3, 4  ;;  %s20_s26 = int_to_ptr.vmem [resolvable:$true] %s19_s26  ;;  %s57_s5 = int_to_ptr.hbm [resolvable:$true] %s56_s5 }
   0x9   :  { %25 = dma.hbm_to_vmem [thread:$0]  %s18_s22, 1024, %s20_s26, [#allocation5], %s4262_s23, %s4262_s23, %s4263_s24  }
   0xa   :  { %s4265_s6 = smov [#allocation9]   ;;  %s4266_s0 = smov [#allocation10]  }
   0xb   :  { %s45_s7 = sshll.u32 %s4265_s6, 4  ;;  %s58_s8 = sshll.u32 %s4266_s0, 4  ;;  %s46_s7 = int_to_ptr.vmem [resolvable:$true] %s45_s7  ;;  %s59_s8 = int_to_ptr.vmem [resolvable:$true] %s58_s8 }
   0xc   :  { %51 = dma.hbm_to_vmem [thread:$0]  %s44_s29, 10240, %s46_s7, [#allocation8], %s4262_s23, %s4262_s23, %s4263_s24  }
   0xd   :  { %s4267_s9 = smov 16   ;;  %s4268_s10 = smov 1  }
   0xe   :  { %64 = dma.hbm_to_vmem [thread:$0]  %s57_s5, 80, %s59_s8, [#allocation11], %s4267_s9, %s4267_s9, %s4268_s10  }
   0xf   :  { %4253 = dma.done.wait [#allocation5], 1024  }
  0x10   :  { %4254 = vsyncadd [#allocation5], 4294966272 }
  0x11   :  { %4255 = dma.done.wait [#allocation8], 11264  }
  0x12   :  { %4256 = vsyncadd [#allocation8], 4294956032 }
  0x13   :  { %4257 = dma.done.wait [#allocation11], 80  }
  0x14   :  { %4258 = vsyncadd [#allocation11], 4294967216  ;;  %v95_v0 = vld [vmem:[#allocation7 + $0x38] sm:$0xff]   ;;  %v93_v1 = vld [vmem:[#allocation7 + $0x30] sm:$0xff]   ;;  %s4269_s2 = smov [#allocation12]   ;;  %s2834_s13 = sshll.u32 %s4470_s4, 4  ;;  %s2835_s13 = int_to_ptr.hbm [resolvable:$true] %s2834_s13 }
  0x15   :  { %v91_v2 = vld [vmem:[#allocation7 + $0x28] sm:$0xff]   ;;  %111 = vst [vmem:[#allocation2 + $0x38] sm:$0xff] %v95_v0   ;;  %v89_v3 = vld [vmem:[#allocation7 + $0x20] sm:$0xff]   ;;  %v87_v4 = vld [vmem:[#allocation7 + $0x18] sm:$0xff]   ;;  %s2832_s3 = sshll.u32 %s4269_s2, 4  ;;  %s4270_s14 = smov 128   ;;  %s2833_s3 = int_to_ptr.vmem [resolvable:$true] %s2832_s3 }
  0x16   :  { %109 = vst [vmem:[#allocation2 + $0x30] sm:$0xff] %v93_v1   ;;  %v85_v5 = vld [vmem:[#allocation7 + $0x10] sm:$0xff]   ;;  %v83_v6 = vld [vmem:[#allocation7 + $0x8] sm:$0xff]   ;;  %v81_v7 = vld [vmem:[#allocation7] sm:$0xff]   ;;  %s4271_s15 = smov 8  }
  0x17   :  { %107 = vst [vmem:[#allocation2 + $0x28] sm:$0xff] %v91_v2   ;;  %v4309_v16 = vld [vmem:[#allocation4] sm:$0xff]  ;;  %v4311_v17 = vld [vmem:[#allocation4 + $0x10] sm:$0xff]  ;;  %v4315_v18 = vld [vmem:[#allocation4 + $0x8] sm:$0xff] }
  0x18   :  { %105 = vst [vmem:[#allocation2 + $0x20] sm:$0xff] %v89_v3   ;;  %v4317_v19 = vld [vmem:[#allocation4 + $0x18] sm:$0xff]  ;;  %v4321_v20 = vld [vmem:[#allocation4 + $0x20] sm:$0xff]  ;;  %v4324_v21 = vld [vmem:[#allocation4 + $0x28] sm:$0xff] }
  0x19   :  { %103 = vst [vmem:[#allocation2 + $0x18] sm:$0xff] %v87_v4   ;;  %v3728_v22 = vld [vmem:[#allocation9 + $0x78] sm:$0xff]  ;;  %v3727_v24 = vld [vmem:[#allocation9 + $0x70] sm:$0xff]  ;;  %v3726_v26 = vld [vmem:[#allocation9 + $0x68] sm:$0xff] }
  0x1a   :  { %101 = vst [vmem:[#allocation2 + $0x10] sm:$0xff] %v85_v5   ;;  %v3720_v23 = vld [vmem:[#allocation9 + $0x38] sm:$0xff]  ;;  %4093 = vmatpush.bf16.msra.mxu2 %v3728_v22  ;;  %v3719_v25 = vld [vmem:[#allocation9 + $0x30] sm:$0xff]  ;;  %v3718_v27 = vld [vmem:[#allocation9 + $0x28] sm:$0xff] }
  0x1b   :  { %99 = vst [vmem:[#allocation2 + $0x8] sm:$0xff] %v83_v6   ;;  %4085 = vmatpush.bf16.msra.mxu1 %v3720_v23  ;;  %v3725_v28 = vld [vmem:[#allocation9 + $0x60] sm:$0xff]  ;;  %v4327_v29 = vld [vmem:[#allocation4 + $0x30] sm:$0xff]  ;;  %v4330_v30 = vld [vmem:[#allocation4 + $0x38] sm:$0xff] }
  0x1c   :  { %v3696_v8 = vld [vmem:[#allocation2 + $0x38] sm:$0xff]  ;;  %97 = vst [vmem:[#allocation2] sm:$0xff] %v81_v7   ;;  %v3717_v32 = vld [vmem:[#allocation9 + $0x20] sm:$0xff]  ;;  %v3723_v33 = vld [vmem:[#allocation9 + $0x50] sm:$0xff] }
  0x1d   :  { %241 = vmatpush.bf16.msra.mxu0 %v3696_v8  ;;  %4077 = vmatpush.bf16.msra.mxu3 %v3696_v8  ;;  %v3695_v9 = vld [vmem:[#allocation2 + $0x30] sm:$0xff]  ;;  %v3724_v31 = vld [vmem:[#allocation9 + $0x58] sm:$0xff]  ;;  %v3722_v37 = vld [vmem:[#allocation9 + $0x48] sm:$0xff] }
  0x1e   :  { %v3694_v10 = vld [vmem:[#allocation2 + $0x28] sm:$0xff]  ;;  %4094 = vmatpush.bf16.msra.mxu2 %v3727_v24  ;;  %v3716_v34 = vld [vmem:[#allocation9 + $0x18] sm:$0xff]  ;;  %v3715_v38 = vld [vmem:[#allocation9 + $0x10] sm:$0xff] }
  0x1f   :  { %v3693_v11 = vld [vmem:[#allocation2 + $0x20] sm:$0xff]  ;;  %4086 = vmatpush.bf16.msra.mxu1 %v3719_v25  ;;  %v3714_v40 = vld [vmem:[#allocation9 + $0x8] sm:$0xff] }
  0x20   :  { %v3692_v12 = vld [vmem:[#allocation2 + $0x18] sm:$0xff]  ;;  %v3721_v39 = vld [vmem:[#allocation9 + $0x40] sm:$0xff]  ;;  %v139_v6 = vld [vmem:[#allocation2 + $0x28] sm:$0xf] }
  0x21   :  { %242 = vmatpush.bf16.msra.mxu0 %v3695_v9  ;;  %4078 = vmatpush.bf16.msra.mxu3 %v3695_v9  ;;  %v3691_v13 = vld [vmem:[#allocation2 + $0x10] sm:$0xff]  ;;  %v3713_v44 = vld [vmem:[#allocation9] sm:$0xff]  ;;  %v135_v45 = vld [vmem:[#allocation2 + $0x18] sm:$0xf]  ;;  %332 = vst [vmem:[#allocation3 + $0x54] sm:$0xf] %v139_v6 }
  0x22   :  { %v3690_v14 = vld [vmem:[#allocation2 + $0x8] sm:$0xff]  ;;  %4095 = vmatpush.bf16.msra.mxu2 %v3726_v26  ;;  %v133_v35 = vld [vmem:[#allocation2 + $0x10] sm:$0xf]  ;;  %v134_v36 = vld [vmem:[#allocation2 + $0x14] sm:$0xf] }
  0x23   :  { %v3689_v15 = vld [vmem:[#allocation2] sm:$0xff]  ;;  %4087 = vmatpush.bf16.msra.mxu1 %v3718_v27  ;;  %326 = vst [vmem:[#allocation3 + $0x24] sm:$0xf] %v133_v35  ;;  %v136_v46 = vld [vmem:[#allocation2 + $0x1c] sm:$0xf] }
  0x24   :  { %327 = vst [vmem:[#allocation3 + $0x2c] sm:$0xf] %v134_v36  ;;  %v137_v52 = vld [vmem:[#allocation2 + $0x20] sm:$0xf]  ;;  %v138_v53 = vld [vmem:[#allocation2 + $0x24] sm:$0xf] }
  0x25   :  { %243 = vmatpush.bf16.msra.mxu0 %v3694_v10  ;;  %4079 = vmatpush.bf16.msra.mxu3 %v3694_v10  ;;  %328 = vst [vmem:[#allocation3 + $0x34] sm:$0xf] %v135_v45  ;;  %v129_v58 = vld [vmem:[#allocation2] sm:$0xf]  ;;  %v130_v59 = vld [vmem:[#allocation2 + $0x4] sm:$0xf] }
  0x26   :  { %4096 = vmatpush.bf16.msra.mxu2 %v3725_v28  ;;  %329 = vst [vmem:[#allocation3 + $0x3c] sm:$0xf] %v136_v46  ;;  %v140_v7 = vld [vmem:[#allocation2 + $0x2c] sm:$0xf] }
  0x27   :  { %4088 = vmatpush.bf16.msra.mxu1 %v3717_v32  ;;  %330 = vst [vmem:[#allocation3 + $0x44] sm:$0xf] %v137_v52 }
  0x28   :  { %331 = vst [vmem:[#allocation3 + $0x4c] sm:$0xf] %v138_v53 }
  0x29   :  { %244 = vmatpush.bf16.msra.mxu0 %v3693_v11  ;;  %4080 = vmatpush.bf16.msra.mxu3 %v3693_v11  ;;  %322 = vst [vmem:[#allocation3 + $0x4] sm:$0xf] %v129_v58 }
  0x2a   :  { %4097 = vmatpush.bf16.msra.mxu2 %v3724_v31  ;;  %v3701_v41 = vld [vmem:[#allocation3 + $0x24] sm:$0xf]  ;;  %323 = vst [vmem:[#allocation3 + $0xc] sm:$0xf] %v130_v59 }
  0x2b   :  { %4089 = vmatpush.bf16.msra.mxu1 %v3716_v34  ;;  %v2933_v42 = vld [vmem:[#allocation3 + $0x28] sm:$0xf0]  ;;  %333 = vst [vmem:[#allocation3 + $0x5c] sm:$0xf] %v140_v7 }
  0x2c   :  { %v2936_v43 = vor.u32 %v3701_v41, %v2933_v42  ;;  %v3703_v47 = vld [vmem:[#allocation3 + $0x34] sm:$0xf] }
  0x2d   :  { %245 = vmatpush.bf16.msra.mxu0 %v3692_v12  ;;  %4081 = vmatpush.bf16.msra.mxu3 %v3692_v12  ;;  %v2941_v48 = vld [vmem:[#allocation3 + $0x38] sm:$0xf0] }
  0x2e   :  { %4098 = vmatpush.bf16.msra.mxu2 %v3723_v33  ;;  %v2944_v49 = vor.u32 %v3703_v47, %v2941_v48  ;;  %v3705_v60 = vld [vmem:[#allocation3 + $0x44] sm:$0xf]  ;;  %v143_v48 = vld [vmem:[#allocation2 + $0x38] sm:$0xf] }
  0x2f   :  { %4090 = vmatpush.bf16.msra.mxu1 %v3715_v38  ;;  %v2949_v61 = vld [vmem:[#allocation3 + $0x48] sm:$0xf0]  ;;  %336 = vst [vmem:[#allocation3 + $0x74] sm:$0xf] %v143_v48 }
  0x30   :  { %v2952_v63 = vor.u32 %v3705_v60, %v2949_v61 }
  0x31   :  { %246 = vmatpush.bf16.msra.mxu0 %v3691_v13  ;;  %4082 = vmatpush.bf16.msra.mxu3 %v3691_v13 }
  0x32   :  { %4099 = vmatpush.bf16.msra.mxu2 %v3722_v37 }
  0x33   :  { %4091 = vmatpush.bf16.msra.mxu1 %v3714_v40 }
  0x35   :  { %247 = vmatpush.bf16.msra.mxu0 %v3690_v14  ;;  %4083 = vmatpush.bf16.msra.mxu3 %v3690_v14 }
  0x36   :  { %4100 = vmatpush.bf16.msra.mxu2 %v3721_v39 }
  0x37   :  { %4092 = vmatpush.bf16.msra.mxu1 %v3713_v44 }
  0x39   :  { %248 = vmatpush.bf16.msra.mxu0 %v3689_v15  ;;  %4084 = vmatpush.bf16.msra.mxu3 %v3689_v15  ;;  %v131_v15 = vld [vmem:[#allocation2 + $0x8] sm:$0xf] }
  0x3a   :  { %633 = vmatmul.bf16.vlgmr.msra.gmra.mxu2 %v2936_v43  ;;  %324 = vst [vmem:[#allocation3 + $0x14] sm:$0xf] %v131_v15  ;;  %v3697_v43 = vld [vmem:[#allocation3 + $0x4] sm:$0xf] }
  0x3c   :  { %249 = vmatmul.bf16.vlgmr.msra.gmra.mxu0 %v4309_v16  ;;  %259 = vmatmul.bf16.vlgmr.msra.gmra.mxu3 %v4311_v17 }
  0x3d   :  { %566 = vmatpush.bf16.msrb.mxu0 %v3720_v23  ;;  %v3707_v23 = vld [vmem:[#allocation3 + $0x54] sm:$0xf] }
  0x41   :  { %567 = vmatpush.bf16.msrb.mxu0 %v3719_v25  ;;  %v3699_v58 = vld [vmem:[#allocation3 + $0x14] sm:$0xf] }
  0x45   :  { %568 = vmatpush.bf16.msrb.mxu0 %v3718_v27 }
  0x49   :  { %569 = vmatpush.bf16.msrb.mxu0 %v3717_v32 }
  0x4a   :  { %638 = vmatmul.bf16.gmra.mxu2 %v2944_v49  ;;  %v144_v49 = vld [vmem:[#allocation2 + $0x3c] sm:$0xf] }
  0x4b   :  { %337 = vst [vmem:[#allocation3 + $0x7c] sm:$0xf] %v144_v49  ;;  %v3762_v49 = vld [vmem:[#allocation9 + $0xc8] sm:$0xff] }
  0x4c   :  { %254 = vmatmul.bf16.gmra.mxu0 %v4315_v18  ;;  %264 = vmatmul.bf16.gmra.mxu3 %v4317_v19 }
  0x4d   :  { %570 = vmatpush.bf16.msrb.mxu0 %v3716_v34  ;;  %v142_v34 = vld [vmem:[#allocation2 + $0x34] sm:$0xf] }
  0x4e   :  { %335 = vst [vmem:[#allocation3 + $0x6c] sm:$0xf] %v142_v34 }
  0x51   :  { %571 = vmatpush.bf16.msrb.mxu0 %v3715_v38 }
  0x55   :  { %572 = vmatpush.bf16.msrb.mxu0 %v3714_v40  ;;  %v2965_v41 = vld [vmem:[#allocation3 + $0x68] sm:$0xf0] }
  0x59   :  { %573 = vmatpush.bf16.msrb.mxu0 %v3713_v44  ;;  %v2917_v44 = vld [vmem:[#allocation3 + $0x8] sm:$0xf0] }
  0x5a   :  { %643 = vmatmul.bf16.gmra.mxu2 %v2952_v63  ;;  %v2920_v47 = vor.u32 %v3697_v43, %v2917_v44 }
  0x5c   :  { %269 = vmatmul.bf16.gmra.mxu3 %v4321_v20 }
  0x5d   :  { %615 = vmatpush.bf16.msra.mxu0 %v3728_v22  ;;  %v132_v22 = vld [vmem:[#allocation2 + $0xc] sm:$0xf] }
  0x5e   :  { %325 = vst [vmem:[#allocation3 + $0x1c] sm:$0xf] %v132_v22 }
  0x61   :  { %616 = vmatpush.bf16.msra.mxu0 %v3727_v24  ;;  %v2957_v24 = vld [vmem:[#allocation3 + $0x58] sm:$0xf0] }
  0x65   :  { %617 = vmatpush.bf16.msra.mxu0 %v3726_v26  ;;  %v2960_v26 = vor.u32 %v3707_v23, %v2957_v24  ;;  %v2925_v59 = vld [vmem:[#allocation3 + $0x18] sm:$0xf0] }
  0x69   :  { %618 = vmatpush.bf16.msra.mxu0 %v3725_v28 }
  0x6a   :  { %648 = vmatmul.bf16.gmra.mxu2 %v2960_v26  ;;  %v3767_v26 = vld [vmem:[#allocation9 + $0xf0] sm:$0xff] }
  0x6c   :  { %274 = vmatmul.bf16.gmra.mxu3 %v4324_v21 }
  0x6d   :  { %619 = vmatpush.bf16.msra.mxu0 %v3724_v31 }
  0x71   :  { %620 = vmatpush.bf16.msra.mxu0 %v3723_v33  ;;  %v141_v33 = vld [vmem:[#allocation2 + $0x30] sm:$0xf] }
  0x72   :  { %334 = vst [vmem:[#allocation3 + $0x64] sm:$0xf] %v141_v33  ;;  %v3766_v33 = vld [vmem:[#allocation9 + $0xe8] sm:$0xff] }
  0x75   :  { %621 = vmatpush.bf16.msra.mxu0 %v3722_v37 }
  0x79   :  { %622 = vmatpush.bf16.msra.mxu0 %v3721_v39  ;;  %v3709_v40 = vld [vmem:[#allocation3 + $0x64] sm:$0xf] }
  0x7a   :  { %v2968_v45 = vor.u32 %v3709_v40, %v2965_v41  ;;  %v3764_v41 = vld [vmem:[#allocation9 + $0xd8] sm:$0xff] }
  0x7c   :  { %279 = vmatmul.bf16.gmra.mxu3 %v4327_v29  ;;  %653 = vmatmul.bf16.gmra.mxu2 %v2968_v45  ;;  %v3763_v45 = vld [vmem:[#allocation9 + $0xd0] sm:$0xff] }
  0x8c   :  { %284 = vmatmul.bf16.gmra.mxu3 %v4330_v30 }
  0xb9   :  { %v250_v50 = vpop.f32.mrf.mxu0 }
  0xba   :  { %v290_v51 = vpack.c.bf16 %v250_v50, %v250_v50 }
  0xbc   :  { %306 = vst [vmem:[#allocation3] sm:$0xf] %v290_v51 }
  0xbd   :  { %v634_v22 = vpop.f32.mrf.mxu2 }
  0xbf   :  { %v260_v54 = vpop.f32.mrf.mxu3 }
  0xc0   :  { %v294_v55 = vpack.c.bf16 %v260_v54, %v260_v54 }
  0xc1   :  { %v252_v56 = vpop.f32.mrf.mxu0 }
  0xc2   :  { %310 = vst [vmem:[#allocation3 + $0x20] sm:$0xf] %v294_v55  ;;  %v291_v57 = vpack.c.bf16 %v252_v56, %v252_v56  ;;  %v3711_v55 = vld [vmem:[#allocation3 + $0x74] sm:$0xf]  ;;  %v2973_v56 = vld [vmem:[#allocation3 + $0x78] sm:$0xf0] }
  0xc3   :  { %v2915_v2 = vld [vmem:[#allocation3] sm:$0xf]  ;;  %v2976_v60 = vor.u32 %v3711_v55, %v2973_v56 }
  0xc4   :  { %307 = vst [vmem:[#allocation3 + $0x8] sm:$0xf] %v291_v57 }
  0xc5   :  { %658 = vmatmul.bf16.gmra.mxu2 %v2976_v60  ;;  %v636_v23 = vpop.f32.mrf.mxu2 }
  0xc7   :  { %v262_v62 = vpop.f32.mrf.mxu3 }
  0xc8   :  { %v295_v0 = vpack.c.bf16 %v262_v62, %v262_v62  ;;  %v2928_v62 = vor.u32 %v3699_v58, %v2925_v59 }
  0xc9   :  { %v255_v1 = vpop.f32.mrf.mxu0  ;;  %v2931_v11 = vld [vmem:[#allocation3 + $0x20] sm:$0xf] }
  0xca   :  { %311 = vst [vmem:[#allocation3 + $0x28] sm:$0xf] %v295_v0  ;;  %v292_v3 = vpack.c.bf16 %v255_v1, %v255_v1 }
  0xcb   :  { %v3698_v4 = vld [vmem:[#allocation3 + $0x4] sm:$0xf0] }
  0xcc   :  { %308 = vst [vmem:[#allocation3 + $0x10] sm:$0xf] %v292_v3  ;;  %v2916_v5 = vor.u32 %v3698_v4, %v2915_v2 }
  0xce   :  { %574 = vmatmul.bf16.vlgmr.msrb.gmra.mxu0 %v2916_v5 }
  0xcf   :  { %v265_v8 = vpop.f32.mrf.mxu3 }
  0xd0   :  { %v296_v9 = vpack.c.bf16 %v265_v8, %v265_v8 }
  0xd1   :  { %v257_v10 = vpop.f32.mrf.mxu0  ;;  %v3702_v12 = vld [vmem:[#allocation3 + $0x24] sm:$0xf0] }
  0xd2   :  { %312 = vst [vmem:[#allocation3 + $0x30] sm:$0xf] %v296_v9  ;;  %v293_v13 = vpack.c.bf16 %v257_v10, %v257_v10  ;;  %v2932_v14 = vor.u32 %v3702_v12, %v2931_v11 }
  0xd3   :  { %v2923_v28 = vld [vmem:[#allocation3 + $0x10] sm:$0xf] }
  0xd4   :  { %309 = vst [vmem:[#allocation3 + $0x18] sm:$0xf] %v293_v13  ;;  %584 = vmatmul.bf16.vlgmr.msra.gmra.mxu1 %v2932_v14 }
  0xd7   :  { %v267_v25 = vpop.f32.mrf.mxu3 }
  0xd8   :  { %v297_v27 = vpack.c.bf16 %v267_v25, %v267_v25  ;;  %v3768_v25 = vld [vmem:[#allocation9 + $0xf8] sm:$0xff] }
  0xd9   :  { %v2939_v37 = vld [vmem:[#allocation3 + $0x30] sm:$0xf]  ;;  %1152 = vmatpush.bf16.msrb.mxu1 %v3768_v25 }
  0xda   :  { %313 = vst [vmem:[#allocation3 + $0x38] sm:$0xf] %v297_v27 }
  0xdb   :  { %v3700_v31 = vld [vmem:[#allocation3 + $0x14] sm:$0xf0] }
  0xdc   :  { %v2924_v32 = vor.u32 %v3700_v31, %v2923_v28  ;;  %v639_v28 = vpop.f32.mrf.mxu2  ;;  %v4333_v31 = vld [vmem:[#allocation10] ss:$0 sm:$0xff] }
  0xdd   :  { %1153 = vmatpush.bf16.msrb.mxu1 %v3767_v26 }
  0xde   :  { %579 = vmatmul.bf16.gmra.mxu0 %v2924_v32 }
  0xdf   :  { %v270_v35 = vpop.f32.mrf.mxu3 }
  0xe0   :  { %v298_v36 = vpack.c.bf16 %v270_v35, %v270_v35  ;;  %v3765_v35 = vld [vmem:[#allocation9 + $0xe0] sm:$0xff] }
  0xe1   :  { %v3704_v38 = vld [vmem:[#allocation3 + $0x34] sm:$0xf0]  ;;  %1154 = vmatpush.bf16.msrb.mxu1 %v3766_v33 }
  0xe2   :  { %314 = vst [vmem:[#allocation3 + $0x40] sm:$0xf] %v298_v36  ;;  %v2940_v39 = vor.u32 %v3704_v38, %v2939_v37 }
  0xe4   :  { %589 = vmatmul.bf16.gmra.mxu1 %v2940_v39  ;;  %v641_v40 = vpop.f32.mrf.mxu2 }
  0xe5   :  { %1155 = vmatpush.bf16.msrb.mxu1 %v3765_v35 }
  0xe7   :  { %v272_v42 = vpop.f32.mrf.mxu3 }
  0xe8   :  { %v299_v46 = vpack.c.bf16 %v272_v42, %v272_v42 }
  0xe9   :  { %v2947_v52 = vld [vmem:[#allocation3 + $0x40] sm:$0xf]  ;;  %1156 = vmatpush.bf16.msrb.mxu1 %v3764_v41 }
  0xea   :  { %315 = vst [vmem:[#allocation3 + $0x48] sm:$0xf] %v299_v46 }
  0xed   :  { %1157 = vmatpush.bf16.msrb.mxu1 %v3763_v45 }
  0xee   :  { %623 = vmatmul.bf16.vlgmr.msra.gmra.mxu0 %v2920_v47 }
  0xef   :  { %v275_v50 = vpop.f32.mrf.mxu3 }
  0xf0   :  { %v300_v51 = vpack.c.bf16 %v275_v50, %v275_v50  ;;  %v644_v50 = vpop.f32.mrf.mxu2 }
  0xf1   :  { %v3706_v53 = vld [vmem:[#allocation3 + $0x44] sm:$0xf0]  ;;  %1158 = vmatpush.bf16.msrb.mxu1 %v3762_v49 }
  0xf2   :  { %316 = vst [vmem:[#allocation3 + $0x50] sm:$0xf] %v300_v51  ;;  %v2948_v54 = vor.u32 %v3706_v53, %v2947_v52  ;;  %v3761_v52 = vld [vmem:[#allocation9 + $0xc0] sm:$0xff] }
  0xf4   :  { %594 = vmatmul.bf16.gmra.mxu1 %v2948_v54 }
  0xf5   :  { %1159 = vmatpush.bf16.msrb.mxu1 %v3761_v52 }
  0xf7   :  { %v277_v57 = vpop.f32.mrf.mxu3 }
  0xf8   :  { %v301_v61 = vpack.c.bf16 %v277_v57, %v277_v57 }
  0xf9   :  { %v2955_v1 = vld [vmem:[#allocation3 + $0x50] sm:$0xf] }
  0xfa   :  { %317 = vst [vmem:[#allocation3 + $0x58] sm:$0xf] %v301_v61 }
  0xfe   :  { %628 = vmatmul.bf16.gmra.mxu0 %v2928_v62 }
  0xff   :  { %v280_v63 = vpop.f32.mrf.mxu3 }
 0x100   :  { %v302_v0 = vpack.c.bf16 %v280_v63, %v280_v63  ;;  %v646_v63 = vpop.f32.mrf.mxu2 }
 0x101   :  { %v3708_v2 = vld [vmem:[#allocation3 + $0x54] sm:$0xf0] }
 0x102   :  { %318 = vst [vmem:[#allocation3 + $0x60] sm:$0xf] %v302_v0  ;;  %v2956_v3 = vor.u32 %v3708_v2, %v2955_v1 }
 0x104   :  { %599 = vmatmul.bf16.gmra.mxu1 %v2956_v3 }
 0x107   :  { %v282_v4 = vpop.f32.mrf.mxu3 }
 0x108   :  { %v303_v5 = vpack.c.bf16 %v282_v4, %v282_v4 }
 0x109   :  { %v2963_v8 = vld [vmem:[#allocation3 + $0x60] sm:$0xf] }
 0x10a   :  { %319 = vst [vmem:[#allocation3 + $0x68] sm:$0xf] %v303_v5 }
 0x10f   :  { %v285_v6 = vpop.f32.mrf.mxu3 }
 0x110   :  { %v304_v7 = vpack.c.bf16 %v285_v6, %v285_v6 }
 0x111   :  { %v3710_v9 = vld [vmem:[#allocation3 + $0x64] sm:$0xf0] }
 0x112   :  { %320 = vst [vmem:[#allocation3 + $0x70] sm:$0xf] %v304_v7  ;;  %v2964_v10 = vor.u32 %v3710_v9, %v2963_v8 }
 0x114   :  { %604 = vmatmul.bf16.gmra.mxu1 %v2964_v10 }
 0x117   :  { %v287_v11 = vpop.f32.mrf.mxu3 }
 0x118   :  { %v305_v12 = vpack.c.bf16 %v287_v11, %v287_v11  ;;  %v649_v11 = vpop.f32.mrf.mxu2 }
 0x119   :  { %v2971_v13 = vld [vmem:[#allocation3 + $0x70] sm:$0xf] }
 0x11a   :  { %321 = vst [vmem:[#allocation3 + $0x78] sm:$0xf] %v305_v12 }
 0x121   :  { %v3712_v14 = vld [vmem:[#allocation3 + $0x74] sm:$0xf0] }
 0x122   :  { %v2972_v15 = vor.u32 %v3712_v14, %v2971_v13 }
 0x124   :  { %609 = vmatmul.bf16.gmra.mxu1 %v2972_v15 }
 0x14b   :  { %v575_v24 = vpop.f32.mrf.mxu0 }
 0x14c   :  { %v576_v59 = vadd.f32 %v4333_v31, %v575_v24 }
 0x151   :  { %v585_v27 = vpop.f32.mrf.mxu1 }
 0x152   :  { %v586_v34 = vadd.f32 %v4333_v31, %v585_v27 }
 0x153   :  { %v577_v32 = vpop.f32.mrf.mxu0 }
 0x154   :  { %v635_v37 = vadd.f32 %v634_v22, %v586_v34  ;;  %v578_v0 = vadd.f32 %v4333_v31, %v577_v32 }
 0x156   :  { %v668_v43 = vmax.f32 %v635_v37, 0.0  ;;  %v651_v37 = vpop.f32.mrf.mxu2 }
 0x159   :  { %v587_v36 = vpop.f32.mrf.mxu1 }
 0x15a   :  { %v588_v38 = vadd.f32 %v4333_v31, %v587_v36 }
 0x15b   :  { %v580_v39 = vpop.f32.mrf.mxu0 }
 0x15c   :  { %v637_v42 = vadd.f32 %v636_v23, %v588_v38  ;;  %v581_v23 = vadd.f32 %v4333_v31, %v580_v39 }
 0x15e   :  { %v669_v44 = vmax.f32 %v637_v42, 0.0  ;;  %v654_v52 = vpop.f32.mrf.mxu2 }
 0x160   :  { %v3902_v46 = vpack.c.bf16 %v669_v44, %v668_v43 }
 0x161   :  { %v590_v47 = vpop.f32.mrf.mxu1 }
 0x162   :  { %4050 = vst [vmem:[#allocation2 + $0x10] sm:$0xff] %v3902_v46   ;;  %v591_v51 = vadd.f32 %v4333_v31, %v590_v47 }
 0x163   :  { %v582_v48 = vpop.f32.mrf.mxu0 }
 0x164   :  { %v640_v56 = vadd.f32 %v639_v28, %v591_v51  ;;  %v583_v27 = vadd.f32 %v4333_v31, %v582_v48 }
 0x166   :  { %v670_v61 = vmax.f32 %v640_v56, 0.0 }
 0x169   :  { %v592_v53 = vpop.f32.mrf.mxu1  ;;  %v716_v54 = vld [vmem:[#allocation2 + $0x10] sm:$0xf]  ;;  %v717_v55 = vld [vmem:[#allocation2 + $0x14] sm:$0xf] }
 0x16a   :  { %v593_v57 = vadd.f32 %v4333_v31, %v592_v53  ;;  %861 = vst [vmem:[#allocation3 + $0x24] sm:$0xf] %v716_v54 }
 0x16b   :  { %v624_v58 = vpop.f32.mrf.mxu0  ;;  %862 = vst [vmem:[#allocation3 + $0x2c] sm:$0xf] %v717_v55 }
 0x16c   :  { %v642_v60 = vadd.f32 %v641_v40, %v593_v57  ;;  %v625_v2 = vadd.f32 %v624_v58, %v576_v59 }
 0x16e   :  { %v671_v62 = vmax.f32 %v642_v60, 0.0  ;;  %v664_v5 = vmax.f32 %v625_v2, 0.0  ;;  %v656_v60 = vpop.f32.mrf.mxu2 }
 0x170   :  { %v3907_v1 = vpack.c.bf16 %v671_v62, %v670_v61 }
 0x171   :  { %v595_v3 = vpop.f32.mrf.mxu1 }
 0x172   :  { %4051 = vst [vmem:[#allocation2 + $0x18] sm:$0xff] %v3907_v1   ;;  %v596_v7 = vadd.f32 %v4333_v31, %v595_v3 }
 0x173   :  { %v626_v4 = vpop.f32.mrf.mxu0 }
 0x174   :  { %v627_v6 = vadd.f32 %v626_v4, %v578_v0  ;;  %v645_v14 = vadd.f32 %v644_v50, %v596_v7 }
 0x176   :  { %v665_v8 = vmax.f32 %v627_v6, 0.0  ;;  %v672_v25 = vmax.f32 %v645_v14, 0.0  ;;  %v3093_v14 = vld [vmem:[#allocation3 + $0x28] sm:$0xf0] }
 0x178   :  { %v3892_v9 = vpack.c.bf16 %v665_v8, %v664_v5 }
 0x179   :  { %v597_v10 = vpop.f32.mrf.mxu1  ;;  %v718_v12 = vld [vmem:[#allocation2 + $0x18] sm:$0xf]  ;;  %v719_v13 = vld [vmem:[#allocation2 + $0x1c] sm:$0xf] }
 0x17a   :  { %3893 = vst [vmem:[#allocation2] sm:$0xff] %v3892_v9   ;;  %v598_v15 = vadd.f32 %v4333_v31, %v597_v10  ;;  %v659_v9 = vpop.f32.mrf.mxu2 }
 0x17b   :  { %v629_v22 = vpop.f32.mrf.mxu0  ;;  %863 = vst [vmem:[#allocation3 + $0x34] sm:$0xf] %v718_v12  ;;  %v3741_v12 = vld [vmem:[#allocation3 + $0x24] sm:$0xf] }
 0x17c   :  { %v647_v24 = vadd.f32 %v646_v63, %v598_v15  ;;  %864 = vst [vmem:[#allocation3 + $0x3c] sm:$0xf] %v719_v13  ;;  %v630_v32 = vadd.f32 %v629_v22, %v581_v23 }
 0x17e   :  { %v673_v26 = vmax.f32 %v647_v24, 0.0  ;;  %v666_v38 = vmax.f32 %v630_v32, 0.0 }
 0x180   :  { %v3912_v28 = vpack.c.bf16 %v673_v26, %v672_v25 }
 0x181   :  { %v600_v33 = vpop.f32.mrf.mxu1  ;;  %v712_v34 = vld [vmem:[#allocation2] sm:$0xf]  ;;  %v713_v35 = vld [vmem:[#allocation2 + $0x4] sm:$0xf] }
 0x182   :  { %4052 = vst [vmem:[#allocation2 + $0x20] sm:$0xff] %v3912_v28   ;;  %v601_v39 = vadd.f32 %v4333_v31, %v600_v33  ;;  %v661_v25 = vpop.f32.mrf.mxu2 }
 0x183   :  { %v631_v36 = vpop.f32.mrf.mxu0  ;;  %857 = vst [vmem:[#allocation3 + $0x4] sm:$0xf] %v712_v34  ;;  %v3743_v34 = vld [vmem:[#allocation3 + $0x34] sm:$0xf] }
 0x184   :  { %v632_v40 = vadd.f32 %v631_v36, %v583_v27  ;;  %858 = vst [vmem:[#allocation3 + $0xc] sm:$0xf] %v713_v35  ;;  %v650_v46 = vadd.f32 %v649_v11, %v601_v39  ;;  %v3096_v27 = vor.u32 %v3741_v12, %v3093_v14  ;;  %v3101_v35 = vld [vmem:[#allocation3 + $0x38] sm:$0xf0] }
 0x186   :  { %v667_v41 = vmax.f32 %v632_v40, 0.0  ;;  %v674_v53 = vmax.f32 %v650_v46, 0.0  ;;  %v3104_v40 = vor.u32 %v3743_v34, %v3101_v35  ;;  %v3731_v46 = vld [vmem:[#allocation2 + $0x10] sm:$0xff] }
 0x188   :  { %v3897_v42 = vpack.c.bf16 %v667_v41, %v666_v38 }
 0x189   :  { %v602_v43 = vpop.f32.mrf.mxu1  ;;  %v720_v44 = vld [vmem:[#allocation2 + $0x20] sm:$0xf]  ;;  %v721_v45 = vld [vmem:[#allocation2 + $0x24] sm:$0xf] }
 0x18a   :  { %4049 = vst [vmem:[#allocation2 + $0x8] sm:$0xff] %v3897_v42   ;;  %v603_v47 = vadd.f32 %v4333_v31, %v602_v43  ;;  %v3737_v48 = vld [vmem:[#allocation3 + $0x4] sm:$0xf]  ;;  %v3732_v42 = vld [vmem:[#allocation2 + $0x18] sm:$0xff] }
 0x18b   :  { %v3077_v49 = vld [vmem:[#allocation3 + $0x8] sm:$0xf0]  ;;  %865 = vst [vmem:[#allocation3 + $0x44] sm:$0xf] %v720_v44  ;;  %v3733_v41 = vld [vmem:[#allocation2 + $0x20] sm:$0xff] }
 0x18c   :  { %v652_v50 = vadd.f32 %v651_v37, %v603_v47  ;;  %v3080_v51 = vor.u32 %v3737_v48, %v3077_v49  ;;  %866 = vst [vmem:[#allocation3 + $0x4c] sm:$0xf] %v721_v45  ;;  %v3729_v48 = vld [vmem:[#allocation2] sm:$0xff] }
 0x18e   :  { %v675_v54 = vmax.f32 %v652_v50, 0.0  ;;  %1160 = vmatmul.bf16.vlgmr.msrb.gmra.mxu1 %v3080_v51 }
 0x190   :  { %v3917_v55 = vpack.c.bf16 %v675_v54, %v674_v53 }
 0x191   :  { %v605_v56 = vpop.f32.mrf.mxu1  ;;  %v714_v57 = vld [vmem:[#allocation2 + $0x8] sm:$0xf]  ;;  %v715_v58 = vld [vmem:[#allocation2 + $0xc] sm:$0xf] }
 0x192   :  { %4053 = vst [vmem:[#allocation2 + $0x28] sm:$0xff] %v3917_v55   ;;  %v606_v59 = vadd.f32 %v4333_v31, %v605_v56  ;;  %v3745_v43 = vld [vmem:[#allocation3 + $0x44] sm:$0xf]  ;;  %v3730_v47 = vld [vmem:[#allocation2 + $0x8] sm:$0xff] }
 0x193   :  { %859 = vst [vmem:[#allocation3 + $0x14] sm:$0xf] %v714_v57  ;;  %v3109_v44 = vld [vmem:[#allocation3 + $0x48] sm:$0xf0] }
 0x194   :  { %860 = vst [vmem:[#allocation3 + $0x1c] sm:$0xf] %v715_v58  ;;  %v655_v0 = vadd.f32 %v654_v52, %v606_v59  ;;  %v3112_v45 = vor.u32 %v3745_v43, %v3109_v44  ;;  %v3759_v58 = vld [vmem:[#allocation9 + $0xb0] sm:$0xff]  ;;  %v3757_v59 = vld [vmem:[#allocation9 + $0xa0] sm:$0xff] }
 0x196   :  { %v676_v6 = vmax.f32 %v655_v0, 0.0 }
 0x199   :  { %v607_v61 = vpop.f32.mrf.mxu1  ;;  %v722_v62 = vld [vmem:[#allocation2 + $0x28] sm:$0xf]  ;;  %v723_v63 = vld [vmem:[#allocation2 + $0x2c] sm:$0xf] }
 0x19a   :  { %v608_v1 = vadd.f32 %v4333_v31, %v607_v61  ;;  %v3739_v2 = vld [vmem:[#allocation3 + $0x14] sm:$0xf]  ;;  %867 = vst [vmem:[#allocation3 + $0x54] sm:$0xf] %v722_v62  ;;  %v3734_v39 = vld [vmem:[#allocation2 + $0x28] sm:$0xff] }
 0x19b   :  { %v3085_v3 = vld [vmem:[#allocation3 + $0x18] sm:$0xf0]  ;;  %868 = vst [vmem:[#allocation3 + $0x5c] sm:$0xf] %v723_v63 }
 0x19c   :  { %v657_v4 = vadd.f32 %v656_v60, %v608_v1  ;;  %v3088_v5 = vor.u32 %v3739_v2, %v3085_v3  ;;  %v3756_v60 = vld [vmem:[#allocation9 + $0x98] sm:$0xff] }
 0x19e   :  { %v677_v7 = vmax.f32 %v657_v4, 0.0  ;;  %1165 = vmatmul.bf16.gmra.mxu1 %v3088_v5 }
 0x1a0   :  { %v3922_v8 = vpack.c.bf16 %v677_v7, %v676_v6 }
 0x1a1   :  { %v610_v10 = vpop.f32.mrf.mxu1  ;;  %v3747_v49 = vld [vmem:[#allocation3 + $0x54] sm:$0xf] }
 0x1a2   :  { %4054 = vst [vmem:[#allocation2 + $0x30] sm:$0xff] %v3922_v8   ;;  %v611_v11 = vadd.f32 %v4333_v31, %v610_v10  ;;  %v3117_v50 = vld [vmem:[#allocation3 + $0x58] sm:$0xf0] }
 0x1a3   :  { %v3120_v51 = vor.u32 %v3747_v49, %v3117_v50 }
 0x1a4   :  { %v660_v23 = vadd.f32 %v659_v9, %v611_v11 }
 0x1a6   :  { %v678_v28 = vmax.f32 %v660_v23, 0.0 }
 0x1a9   :  { %v612_v13 = vpop.f32.mrf.mxu1  ;;  %v724_v15 = vld [vmem:[#allocation2 + $0x30] sm:$0xf]  ;;  %v725_v22 = vld [vmem:[#allocation2 + $0x34] sm:$0xf] }
 0x1aa   :  { %v613_v24 = vadd.f32 %v4333_v31, %v612_v13  ;;  %869 = vst [vmem:[#allocation3 + $0x64] sm:$0xf] %v724_v15  ;;  %v3735_v31 = vld [vmem:[#allocation2 + $0x30] sm:$0xff] }
 0x1ab   :  { %870 = vst [vmem:[#allocation3 + $0x6c] sm:$0xf] %v725_v22 }
 0x1ac   :  { %v662_v26 = vadd.f32 %v661_v25, %v613_v24 }
 0x1ae   :  { %v679_v32 = vmax.f32 %v662_v26, 0.0  ;;  %1170 = vmatmul.bf16.gmra.mxu1 %v3096_v27 }
 0x1b0   :  { %v3927_v33 = vpack.c.bf16 %v679_v32, %v678_v28 }
 0x1b1   :  { %v3749_v52 = vld [vmem:[#allocation3 + $0x64] sm:$0xf] }
 0x1b2   :  { %4055 = vst [vmem:[#allocation2 + $0x38] sm:$0xff] %v3927_v33   ;;  %v3125_v53 = vld [vmem:[#allocation3 + $0x68] sm:$0xf0] }
 0x1b3   :  { %v3128_v54 = vor.u32 %v3749_v52, %v3125_v53 }
 0x1b9   :  { %v3736_v36 = vld [vmem:[#allocation2 + $0x38] sm:$0xff] }
 0x1ba   :  { %v726_v37 = vld [vmem:[#allocation2 + $0x38] sm:$0xf]  ;;  %v727_v38 = vld [vmem:[#allocation2 + $0x3c] sm:$0xf]  ;;  %776 = vmatpush.bf16.msrb.mxu3 %v3736_v36 }
 0x1bb   :  { %871 = vst [vmem:[#allocation3 + $0x74] sm:$0xf] %v726_v37 }
 0x1bc   :  { %872 = vst [vmem:[#allocation3 + $0x7c] sm:$0xf] %v727_v38 }
 0x1be   :  { %1175 = vmatmul.bf16.gmra.mxu1 %v3104_v40  ;;  %777 = vmatpush.bf16.msrb.mxu3 %v3735_v31 }
 0x1c2   :  { %778 = vmatpush.bf16.msrb.mxu3 %v3734_v39  ;;  %v3751_v55 = vld [vmem:[#allocation3 + $0x74] sm:$0xf] }
 0x1c3   :  { %v3133_v56 = vld [vmem:[#allocation3 + $0x78] sm:$0xf0] }
 0x1c4   :  { %v3136_v57 = vor.u32 %v3751_v55, %v3133_v56 }
 0x1c6   :  { %779 = vmatpush.bf16.msrb.mxu3 %v3733_v41 }
 0x1ca   :  { %780 = vmatpush.bf16.msrb.mxu3 %v3732_v42 }
 0x1ce   :  { %1180 = vmatmul.bf16.gmra.mxu1 %v3112_v45  ;;  %781 = vmatpush.bf16.msrb.mxu3 %v3731_v46 }
 0x1d2   :  { %782 = vmatpush.bf16.msrb.mxu3 %v3730_v47 }
 0x1d6   :  { %783 = vmatpush.bf16.msrb.mxu3 %v3729_v48 }
 0x1d9   :  { %784 = vmatmul.bf16.vlgmr.msrb.gmra.mxu3 %v4309_v16  ;;  %v3760_v16 = vld [vmem:[#allocation9 + $0xb8] sm:$0xff] }
 0x1da   :  { %1103 = vmatpush.bf16.msrb.mxu0 %v3760_v16  ;;  %v3806_v16 = vld [vmem:[#allocation9 + $0x168] sm:$0xff] }
 0x1de   :  { %1185 = vmatmul.bf16.gmra.mxu1 %v3120_v51  ;;  %1104 = vmatpush.bf16.msrb.mxu0 %v3759_v58 }
 0x1e9   :  { %789 = vmatmul.bf16.gmra.mxu3 %v4315_v18  ;;  %v3758_v18 = vld [vmem:[#allocation9 + $0xa8] sm:$0xff] }
 0x1ea   :  { %1105 = vmatpush.bf16.msrb.mxu0 %v3758_v18 }
 0x1ee   :  { %1190 = vmatmul.bf16.gmra.mxu1 %v3128_v54  ;;  %1106 = vmatpush.bf16.msrb.mxu0 %v3757_v59  ;;  %v3808_v54 = vld [vmem:[#allocation9 + $0x178] sm:$0xff] }
 0x1f2   :  { %1107 = vmatpush.bf16.msrb.mxu0 %v3756_v60  ;;  %v3805_v60 = vld [vmem:[#allocation9 + $0x160] sm:$0xff] }
 0x1f9   :  { %794 = vmatmul.bf16.gmra.mxu3 %v4311_v17  ;;  %v3755_v17 = vld [vmem:[#allocation9 + $0x90] sm:$0xff] }
 0x1fa   :  { %1108 = vmatpush.bf16.msrb.mxu0 %v3755_v17 }
 0x1fe   :  { %1195 = vmatmul.bf16.gmra.mxu1 %v3136_v57  ;;  %v3807_v57 = vld [vmem:[#allocation9 + $0x170] sm:$0xff] }
 0x209   :  { %799 = vmatmul.bf16.gmra.mxu3 %v4317_v19  ;;  %v3754_v19 = vld [vmem:[#allocation9 + $0x88] sm:$0xff] }
 0x20a   :  { %1109 = vmatpush.bf16.msrb.mxu0 %v3754_v19  ;;  %v3804_v19 = vld [vmem:[#allocation9 + $0x158] sm:$0xff] }
 0x20b   :  { %v1161_v53 = vpop.f32.mrf.mxu1 }
 0x213   :  { %v1163_v58 = vpop.f32.mrf.mxu1 }
 0x219   :  { %804 = vmatmul.bf16.gmra.mxu3 %v4321_v20  ;;  %v3753_v20 = vld [vmem:[#allocation9 + $0x80] sm:$0xff] }
 0x21a   :  { %1110 = vmatpush.bf16.msrb.mxu0 %v3753_v20 }
 0x21b   :  { %v1166_v20 = vpop.f32.mrf.mxu1 }
 0x21e   :  { %1689 = vmatpush.bf16.msra.mxu0 %v3808_v54 }
 0x222   :  { %1690 = vmatpush.bf16.msra.mxu0 %v3807_v57 }
 0x226   :  { %1691 = vmatpush.bf16.msra.mxu0 %v3806_v16 }
 0x229   :  { %809 = vmatmul.bf16.gmra.mxu3 %v4324_v21 }
 0x22a   :  { %1692 = vmatpush.bf16.msra.mxu0 %v3805_v60 }
 0x22e   :  { %1693 = vmatpush.bf16.msra.mxu0 %v3804_v19 }
 0x239   :  { %814 = vmatmul.bf16.gmra.mxu3 %v4327_v29 }
 0x249   :  { %819 = vmatmul.bf16.gmra.mxu3 %v4330_v30 }
 0x25c   :  { %v785_v21 = vpop.f32.mrf.mxu3 }
 0x25d   :  { %v825_v61 = vpack.c.bf16 %v785_v21, %v785_v21  ;;  %v3803_v21 = vld [vmem:[#allocation9 + $0x150] sm:$0xff] }
 0x25e   :  { %1694 = vmatpush.bf16.msra.mxu0 %v3803_v21 }
 0x25f   :  { %841 = vst [vmem:[#allocation3] sm:$0xf] %v825_v61  ;;  %v3802_v61 = vld [vmem:[#allocation9 + $0x148] sm:$0xff] }
 0x262   :  { %1695 = vmatpush.bf16.msra.mxu0 %v3802_v61 }
 0x264   :  { %v787_v62 = vpop.f32.mrf.mxu3 }
 0x265   :  { %v826_v63 = vpack.c.bf16 %v787_v62, %v787_v62 }
 0x266   :  { %v3075_v1 = vld [vmem:[#allocation3] sm:$0xf] }
 0x267   :  { %842 = vst [vmem:[#allocation3 + $0x8] sm:$0xf] %v826_v63  ;;  %v3801_v63 = vld [vmem:[#allocation9 + $0x140] sm:$0xff] }
 0x268   :  { %1696 = vmatpush.bf16.msra.mxu0 %v3801_v63 }
 0x26c   :  { %v790_v29 = vpop.f32.mrf.mxu3 }
 0x26d   :  { %v827_v0 = vpack.c.bf16 %v790_v29, %v790_v29  ;;  %v4359_v29 = vld [vmem:[#allocation10 + $0x1] ss:$0 sm:$0xff] }
 0x26e   :  { %v3738_v2 = vld [vmem:[#allocation3 + $0x4] sm:$0xf0] }
 0x26f   :  { %843 = vst [vmem:[#allocation3 + $0x10] sm:$0xf] %v827_v0  ;;  %v3076_v3 = vor.u32 %v3738_v2, %v3075_v1  ;;  %v1168_v0 = vpop.f32.mrf.mxu1 }
 0x271   :  { %1111 = vmatmul.bf16.vlgmr.msrb.gmra.mxu0 %v3076_v3 }
 0x274   :  { %v792_v4 = vpop.f32.mrf.mxu3 }
 0x275   :  { %v828_v5 = vpack.c.bf16 %v792_v4, %v792_v4 }
 0x276   :  { %v3083_v7 = vld [vmem:[#allocation3 + $0x10] sm:$0xf] }
 0x277   :  { %844 = vst [vmem:[#allocation3 + $0x18] sm:$0xf] %v828_v5 }
 0x27c   :  { %v795_v30 = vpop.f32.mrf.mxu3 }
 0x27d   :  { %v829_v6 = vpack.c.bf16 %v795_v30, %v795_v30  ;;  %v1171_v30 = vpop.f32.mrf.mxu1 }
 0x27e   :  { %v3740_v8 = vld [vmem:[#allocation3 + $0x14] sm:$0xf0] }
 0x27f   :  { %845 = vst [vmem:[#allocation3 + $0x20] sm:$0xf] %v829_v6  ;;  %v3084_v9 = vor.u32 %v3740_v8, %v3083_v7 }
 0x281   :  { %1116 = vmatmul.bf16.gmra.mxu0 %v3084_v9 }
 0x284   :  { %v797_v10 = vpop.f32.mrf.mxu3 }
 0x285   :  { %v830_v11 = vpack.c.bf16 %v797_v10, %v797_v10 }
 0x286   :  { %v3091_v14 = vld [vmem:[#allocation3 + $0x20] sm:$0xf] }
 0x287   :  { %846 = vst [vmem:[#allocation3 + $0x28] sm:$0xf] %v830_v11  ;;  %v1173_v11 = vpop.f32.mrf.mxu1 }
 0x28c   :  { %v800_v12 = vpop.f32.mrf.mxu3 }
 0x28d   :  { %v831_v13 = vpack.c.bf16 %v800_v12, %v800_v12 }
 0x28e   :  { %v3742_v15 = vld [vmem:[#allocation3 + $0x24] sm:$0xf0] }
 0x28f   :  { %847 = vst [vmem:[#allocation3 + $0x30] sm:$0xf] %v831_v13  ;;  %v3092_v22 = vor.u32 %v3742_v15, %v3091_v14 }
 0x291   :  { %1121 = vmatmul.bf16.gmra.mxu0 %v3092_v22 }
 0x294   :  { %v802_v23 = vpop.f32.mrf.mxu3 }
 0x295   :  { %v832_v24 = vpack.c.bf16 %v802_v23, %v802_v23 }
 0x296   :  { %v3099_v27 = vld [vmem:[#allocation3 + $0x30] sm:$0xf] }
 0x297   :  { %848 = vst [vmem:[#allocation3 + $0x38] sm:$0xf] %v832_v24 }
 0x29c   :  { %v805_v25 = vpop.f32.mrf.mxu3 }
 0x29d   :  { %v833_v26 = vpack.c.bf16 %v805_v25, %v805_v25 }
 0x29e   :  { %v3744_v28 = vld [vmem:[#allocation3 + $0x34] sm:$0xf0] }
 0x29f   :  { %849 = vst [vmem:[#allocation3 + $0x40] sm:$0xf] %v833_v26  ;;  %v3100_v32 = vor.u32 %v3744_v28, %v3099_v27  ;;  %v1176_v27 = vpop.f32.mrf.mxu1 }
 0x2a1   :  { %1126 = vmatmul.bf16.gmra.mxu0 %v3100_v32 }
 0x2a4   :  { %v807_v33 = vpop.f32.mrf.mxu3 }
 0x2a5   :  { %v834_v34 = vpack.c.bf16 %v807_v33, %v807_v33 }
 0x2a6   :  { %v3107_v37 = vld [vmem:[#allocation3 + $0x40] sm:$0xf] }
 0x2a7   :  { %850 = vst [vmem:[#allocation3 + $0x48] sm:$0xf] %v834_v34 }
 0x2ac   :  { %v810_v35 = vpop.f32.mrf.mxu3 }
 0x2ad   :  { %v835_v36 = vpack.c.bf16 %v810_v35, %v810_v35 }
 0x2ae   :  { %v3746_v38 = vld [vmem:[#allocation3 + $0x44] sm:$0xf0] }
 0x2af   :  { %851 = vst [vmem:[#allocation3 + $0x50] sm:$0xf] %v835_v36  ;;  %v3108_v40 = vor.u32 %v3746_v38, %v3107_v37 }
 0x2b1   :  { %1131 = vmatmul.bf16.gmra.mxu0 %v3108_v40 }
 0x2b4   :  { %v812_v31 = vpop.f32.mrf.mxu3 }
 0x2b5   :  { %v836_v39 = vpack.c.bf16 %v812_v31, %v812_v31 }
 0x2b6   :  { %v3115_v43 = vld [vmem:[#allocation3 + $0x50] sm:$0xf] }
 0x2b7   :  { %852 = vst [vmem:[#allocation3 + $0x58] sm:$0xf] %v836_v39  ;;  %v1178_v39 = vpop.f32.mrf.mxu1 }
 0x2bc   :  { %v815_v41 = vpop.f32.mrf.mxu3 }
 0x2bd   :  { %v837_v42 = vpack.c.bf16 %v815_v41, %v815_v41 }
 0x2be   :  { %v3748_v44 = vld [vmem:[#allocation3 + $0x54] sm:$0xf0] }
 0x2bf   :  { %853 = vst [vmem:[#allocation3 + $0x60] sm:$0xf] %v837_v42  ;;  %v3116_v45 = vor.u32 %v3748_v44, %v3115_v43 }
 0x2c1   :  { %1136 = vmatmul.bf16.gmra.mxu0 %v3116_v45 }
 0x2c4   :  { %v817_v46 = vpop.f32.mrf.mxu3 }
 0x2c5   :  { %v838_v47 = vpack.c.bf16 %v817_v46, %v817_v46 }
 0x2c6   :  { %v3123_v50 = vld [vmem:[#allocation3 + $0x60] sm:$0xf] }
 0x2c7   :  { %854 = vst [vmem:[#allocation3 + $0x68] sm:$0xf] %v838_v47 }
 0x2cc   :  { %v820_v48 = vpop.f32.mrf.mxu3 }
 0x2cd   :  { %v839_v49 = vpack.c.bf16 %v820_v48, %v820_v48 }
 0x2ce   :  { %v3750_v51 = vld [vmem:[#allocation3 + $0x64] sm:$0xf0] }
 0x2cf   :  { %855 = vst [vmem:[#allocation3 + $0x70] sm:$0xf] %v839_v49  ;;  %v3124_v52 = vor.u32 %v3750_v51, %v3123_v50  ;;  %v1181_v49 = vpop.f32.mrf.mxu1 }
 0x2d1   :  { %1141 = vmatmul.bf16.gmra.mxu0 %v3124_v52 }
 0x2d4   :  { %v822_v55 = vpop.f32.mrf.mxu3 }
 0x2d5   :  { %v840_v56 = vpack.c.bf16 %v822_v55, %v822_v55 }
 0x2d6   :  { %v3131_v18 = vld [vmem:[#allocation3 + $0x70] sm:$0xf] }
 0x2d7   :  { %856 = vst [vmem:[#allocation3 + $0x78] sm:$0xf] %v840_v56 }
 0x2de   :  { %v3752_v59 = vld [vmem:[#allocation3 + $0x74] sm:$0xf0] }
 0x2df   :  { %v3132_v17 = vor.u32 %v3752_v59, %v3131_v18 }
 0x2e1   :  { %1146 = vmatmul.bf16.gmra.mxu0 %v3132_v17 }
 0x2ee   :  { %v1112_v62 = vpop.f32.mrf.mxu0 }
 0x2ef   :  { %v1113_v1 = vadd.f32 %v4359_v29, %v1112_v62 }
 0x2f1   :  { %v1162_v3 = vadd.f32 %v1161_v53, %v1113_v1 }
 0x2f3   :  { %v1201_v6 = vmax.f32 %v1162_v3, 0.0 }
 0x2f6   :  { %v1114_v2 = vpop.f32.mrf.mxu0 }
 0x2f7   :  { %v1115_v4 = vadd.f32 %v4359_v29, %v1114_v2 }
 0x2f9   :  { %v1164_v5 = vadd.f32 %v1163_v58, %v1115_v4  ;;  %v1183_v58 = vpop.f32.mrf.mxu1 }
 0x2fb   :  { %v1202_v7 = vmax.f32 %v1164_v5, 0.0 }
 0x2fd   :  { %v3932_v8 = vpack.c.bf16 %v1202_v7, %v1201_v6 }
 0x2fe   :  { %v1117_v9 = vpop.f32.mrf.mxu0 }
 0x2ff   :  { %3933 = vst [vmem:[#allocation2] sm:$0xff] %v3932_v8   ;;  %v1118_v10 = vadd.f32 %v4359_v29, %v1117_v9 }
 0x301   :  { %v1167_v15 = vadd.f32 %v1166_v20, %v1118_v10  ;;  %v1186_v21 = vpop.f32.mrf.mxu1 }
 0x303   :  { %v1203_v24 = vmax.f32 %v1167_v15, 0.0 }
 0x306   :  { %v1119_v12 = vpop.f32.mrf.mxu0  ;;  %v1249_v13 = vld [vmem:[#allocation2] sm:$0xf]  ;;  %v1250_v14 = vld [vmem:[#allocation2 + $0x4] sm:$0xf] }
 0x307   :  { %v1120_v22 = vadd.f32 %v4359_v29, %v1119_v12  ;;  %1394 = vst [vmem:[#allocation3 + $0x4] sm:$0xf] %v1249_v13 }
 0x308   :  { %1395 = vst [vmem:[#allocation3 + $0xc] sm:$0xf] %v1250_v14 }
 0x309   :  { %v1169_v23 = vadd.f32 %v1168_v0, %v1120_v22  ;;  %v1188_v8 = vpop.f32.mrf.mxu1 }
 0x30b   :  { %v1204_v25 = vmax.f32 %v1169_v23, 0.0 }
 0x30d   :  { %v3937_v26 = vpack.c.bf16 %v1204_v25, %v1203_v24 }
 0x30e   :  { %v1122_v28 = vpop.f32.mrf.mxu0  ;;  %v3777_v32 = vld [vmem:[#allocation3 + $0x4] sm:$0xf] }
 0x30f   :  { %4056 = vst [vmem:[#allocation2 + $0x8] sm:$0xff] %v3937_v26   ;;  %v3237_v33 = vld [vmem:[#allocation3 + $0x8] sm:$0xf0]  ;;  %v1123_v35 = vadd.f32 %v4359_v29, %v1122_v28 }
 0x310   :  { %v3240_v34 = vor.u32 %v3777_v32, %v3237_v33 }
 0x311   :  { %v1172_v40 = vadd.f32 %v1171_v30, %v1123_v35  ;;  %v1191_v23 = vpop.f32.mrf.mxu1 }
 0x312   :  { %1697 = vmatmul.bf16.vlgmr.msra.gmra.mxu0 %v3240_v34 }
 0x313   :  { %v1205_v42 = vmax.f32 %v1172_v40, 0.0 }
 0x316   :  { %v1124_v36 = vpop.f32.mrf.mxu0  ;;  %v1251_v37 = vld [vmem:[#allocation2 + $0x8] sm:$0xf]  ;;  %v1252_v38 = vld [vmem:[#allocation2 + $0xc] sm:$0xf] }
 0x317   :  { %v1125_v31 = vadd.f32 %v4359_v29, %v1124_v36  ;;  %1396 = vst [vmem:[#allocation3 + $0x14] sm:$0xf] %v1251_v37 }
 0x318   :  { %1397 = vst [vmem:[#allocation3 + $0x1c] sm:$0xf] %v1252_v38 }
 0x319   :  { %v1174_v41 = vadd.f32 %v1173_v11, %v1125_v31  ;;  %v1193_v35 = vpop.f32.mrf.mxu1 }
 0x31b   :  { %v1206_v43 = vmax.f32 %v1174_v41, 0.0 }
 0x31d   :  { %v3942_v44 = vpack.c.bf16 %v1206_v43, %v1205_v42 }
 0x31e   :  { %v1127_v45 = vpop.f32.mrf.mxu0  ;;  %v3779_v46 = vld [vmem:[#allocation3 + $0x14] sm:$0xf] }
 0x31f   :  { %4057 = vst [vmem:[#allocation2 + $0x10] sm:$0xff] %v3942_v44   ;;  %v3245_v47 = vld [vmem:[#allocation3 + $0x18] sm:$0xf0]  ;;  %v1128_v50 = vadd.f32 %v4359_v29, %v1127_v45 }
 0x320   :  { %v3248_v48 = vor.u32 %v3779_v46, %v3245_v47 }
 0x321   :  { %v1177_v54 = vadd.f32 %v1176_v27, %v1128_v50  ;;  %v1196_v44 = vpop.f32.mrf.mxu1 }
 0x322   :  { %1702 = vmatmul.bf16.gmra.mxu0 %v3248_v48 }
 0x323   :  { %v1207_v57 = vmax.f32 %v1177_v54, 0.0 }
 0x326   :  { %v1129_v51 = vpop.f32.mrf.mxu0  ;;  %v1253_v52 = vld [vmem:[#allocation2 + $0x10] sm:$0xf]  ;;  %v1254_v53 = vld [vmem:[#allocation2 + $0x14] sm:$0xf] }
 0x327   :  { %v1130_v55 = vadd.f32 %v4359_v29, %v1129_v51  ;;  %1398 = vst [vmem:[#allocation3 + $0x24] sm:$0xf] %v1253_v52 }
 0x328   :  { %1399 = vst [vmem:[#allocation3 + $0x2c] sm:$0xf] %v1254_v53 }
 0x329   :  { %v1179_v56 = vadd.f32 %v1178_v39, %v1130_v55  ;;  %v1198_v55 = vpop.f32.mrf.mxu1 }
 0x32b   :  { %v1208_v16 = vmax.f32 %v1179_v56, 0.0 }
 0x32d   :  { %v3947_v18 = vpack.c.bf16 %v1208_v16, %v1207_v57 }
 0x32e   :  { %v1132_v59 = vpop.f32.mrf.mxu0  ;;  %v3781_v60 = vld [vmem:[#allocation3 + $0x24] sm:$0xf] }
 0x32f   :  { %4058 = vst [vmem:[#allocation2 + $0x18] sm:$0xff] %v3947_v18   ;;  %v3253_v17 = vld [vmem:[#allocation3 + $0x28] sm:$0xf0]  ;;  %v1133_v20 = vadd.f32 %v4359_v29, %v1132_v59 }
 0x330   :  { %v3256_v19 = vor.u32 %v3781_v60, %v3253_v17 }
 0x331   :  { %v1182_v0 = vadd.f32 %v1181_v49, %v1133_v20 }
 0x332   :  { %1707 = vmatmul.bf16.gmra.mxu0 %v3256_v19 }
 0x333   :  { %v1209_v3 = vmax.f32 %v1182_v0, 0.0 }
 0x336   :  { %v1134_v61 = vpop.f32.mrf.mxu0  ;;  %v1255_v62 = vld [vmem:[#allocation2 + $0x18] sm:$0xf]  ;;  %v1256_v63 = vld [vmem:[#allocation2 + $0x1c] sm:$0xf] }
 0x337   :  { %v1135_v1 = vadd.f32 %v4359_v29, %v1134_v61  ;;  %1400 = vst [vmem:[#allocation3 + $0x34] sm:$0xf] %v1255_v62 }
 0x338   :  { %1401 = vst [vmem:[#allocation3 + $0x3c] sm:$0xf] %v1256_v63 }
 0x339   :  { %v1184_v2 = vadd.f32 %v1183_v58, %v1135_v1  ;;  %v3772_v1 = vld [vmem:[#allocation2 + $0x18] sm:$0xff] }
 0x33b   :  { %v1210_v4 = vmax.f32 %v1184_v2, 0.0  ;;  %v3771_v2 = vld [vmem:[#allocation2 + $0x10] sm:$0xff] }
 0x33d   :  { %v3952_v5 = vpack.c.bf16 %v1210_v4, %v1209_v3  ;;  %v3770_v3 = vld [vmem:[#allocation2 + $0x8] sm:$0xff]  ;;  %v3769_v4 = vld [vmem:[#allocation2] sm:$0xff] }
 0x33e   :  { %v1137_v30 = vpop.f32.mrf.mxu0  ;;  %v3783_v6 = vld [vmem:[#allocation3 + $0x34] sm:$0xf] }
 0x33f   :  { %4059 = vst [vmem:[#allocation2 + $0x20] sm:$0xff] %v3952_v5   ;;  %v3261_v7 = vld [vmem:[#allocation3 + $0x38] sm:$0xf0]  ;;  %v1138_v10 = vadd.f32 %v4359_v29, %v1137_v30  ;;  %v4377_v5 = vld [vmem:[#allocation4] sm:$0xff]  ;;  %v4380_v30 = vld [vmem:[#allocation4 + $0x8] sm:$0xff] }
 0x340   :  { %v3264_v9 = vor.u32 %v3783_v6, %v3261_v7  ;;  %v4383_v6 = vld [vmem:[#allocation4 + $0x10] sm:$0xff]  ;;  %v4386_v7 = vld [vmem:[#allocation4 + $0x18] sm:$0xff] }
 0x341   :  { %v1187_v14 = vadd.f32 %v1186_v21, %v1138_v10  ;;  %v3800_v10 = vld [vmem:[#allocation9 + $0x138] sm:$0xff] }
 0x342   :  { %1712 = vmatmul.bf16.gmra.mxu0 %v3264_v9  ;;  %v4392_v9 = vld [vmem:[#allocation4 + $0x28] sm:$0xff]  ;;  %1640 = vmatpush.bf16.msra.mxu3 %v3800_v10 }
 0x343   :  { %v1211_v24 = vmax.f32 %v1187_v14, 0.0  ;;  %v3797_v14 = vld [vmem:[#allocation9 + $0x120] sm:$0xff] }
 0x346   :  { %v1139_v11 = vpop.f32.mrf.mxu0  ;;  %v1257_v12 = vld [vmem:[#allocation2 + $0x20] sm:$0xf]  ;;  %v1258_v13 = vld [vmem:[#allocation2 + $0x24] sm:$0xf] }
 0x347   :  { %v1140_v15 = vadd.f32 %v4359_v29, %v1139_v11  ;;  %1402 = vst [vmem:[#allocation3 + $0x44] sm:$0xf] %v1257_v12  ;;  %v3773_v0 = vld [vmem:[#allocation2 + $0x20] sm:$0xff]  ;;  %v3799_v11 = vld [vmem:[#allocation9 + $0x130] sm:$0xff]  ;;  %v3798_v12 = vld [vmem:[#allocation9 + $0x128] sm:$0xff] }
 0x348   :  { %1403 = vst [vmem:[#allocation3 + $0x4c] sm:$0xf] %v1258_v13  ;;  %1641 = vmatpush.bf16.msra.mxu3 %v3799_v11  ;;  %v4395_v13 = vld [vmem:[#allocation4 + $0x30] sm:$0xff] }
 0x349   :  { %v1189_v22 = vadd.f32 %v1188_v8, %v1140_v15  ;;  %v4389_v8 = vld [vmem:[#allocation4 + $0x20] sm:$0xff]  ;;  %v3796_v15 = vld [vmem:[#allocation9 + $0x118] sm:$0xff] }
 0x34b   :  { %v1212_v25 = vmax.f32 %v1189_v22, 0.0  ;;  %v3795_v22 = vld [vmem:[#allocation9 + $0x110] sm:$0xff] }
 0x34c   :  { %1642 = vmatpush.bf16.msra.mxu3 %v3798_v12 }
 0x34d   :  { %v3957_v26 = vpack.c.bf16 %v1212_v25, %v1211_v24  ;;  %v4398_v24 = vld [vmem:[#allocation4 + $0x38] sm:$0xff]  ;;  %v3793_v25 = vld [vmem:[#allocation9 + $0x100] sm:$0xff] }
 0x34e   :  { %v1142_v27 = vpop.f32.mrf.mxu0  ;;  %v3785_v28 = vld [vmem:[#allocation3 + $0x44] sm:$0xf] }
 0x34f   :  { %4060 = vst [vmem:[#allocation2 + $0x28] sm:$0xff] %v3957_v26   ;;  %v3269_v32 = vld [vmem:[#allocation3 + $0x48] sm:$0xf0]  ;;  %v1143_v34 = vadd.f32 %v4359_v29, %v1142_v27 }
 0x350   :  { %v3272_v33 = vor.u32 %v3785_v28, %v3269_v32  ;;  %1643 = vmatpush.bf16.msra.mxu3 %v3797_v14 }
 0x351   :  { %v1192_v40 = vadd.f32 %v1191_v23, %v1143_v34  ;;  %v3794_v23 = vld [vmem:[#allocation9 + $0x108] sm:$0xff] }
 0x352   :  { %1717 = vmatmul.bf16.gmra.mxu0 %v3272_v33 }
 0x353   :  { %v1213_v41 = vmax.f32 %v1192_v40, 0.0 }
 0x354   :  { %1644 = vmatpush.bf16.msra.mxu3 %v3796_v15 }
 0x356   :  { %v1144_v36 = vpop.f32.mrf.mxu0  ;;  %v1259_v37 = vld [vmem:[#allocation2 + $0x28] sm:$0xf]  ;;  %v1260_v38 = vld [vmem:[#allocation2 + $0x2c] sm:$0xf] }
 0x357   :  { %v1145_v31 = vadd.f32 %v4359_v29, %v1144_v36  ;;  %1404 = vst [vmem:[#allocation3 + $0x54] sm:$0xf] %v1259_v37 }
 0x358   :  { %1405 = vst [vmem:[#allocation3 + $0x5c] sm:$0xf] %v1260_v38  ;;  %1645 = vmatpush.bf16.msra.mxu3 %v3795_v22 }
 0x359   :  { %v1194_v39 = vadd.f32 %v1193_v35, %v1145_v31 }
 0x35b   :  { %v1214_v42 = vmax.f32 %v1194_v39, 0.0 }
 0x35c   :  { %1646 = vmatpush.bf16.msra.mxu3 %v3794_v23  ;;  %v3848_v23 = vld [vmem:[#allocation9 + $0x1f8] sm:$0xff] }
 0x35d   :  { %v3962_v43 = vpack.c.bf16 %v1214_v42, %v1213_v41 }
 0x35e   :  { %v1147_v45 = vpop.f32.mrf.mxu0  ;;  %v3787_v46 = vld [vmem:[#allocation3 + $0x54] sm:$0xf] }
 0x35f   :  { %4061 = vst [vmem:[#allocation2 + $0x30] sm:$0xff] %v3962_v43   ;;  %v3277_v47 = vld [vmem:[#allocation3 + $0x58] sm:$0xf0]  ;;  %v1148_v49 = vadd.f32 %v4359_v29, %v1147_v45 }
 0x360   :  { %v3280_v48 = vor.u32 %v3787_v46, %v3277_v47  ;;  %1647 = vmatpush.bf16.msra.mxu3 %v3793_v25  ;;  %v3847_v25 = vld [vmem:[#allocation9 + $0x1f0] sm:$0xff] }
 0x361   :  { %v1197_v53 = vadd.f32 %v1196_v44, %v1148_v49 }
 0x362   :  { %1722 = vmatmul.bf16.gmra.mxu0 %v3280_v48 }
 0x363   :  { %v1215_v57 = vmax.f32 %v1197_v53, 0.0 }
 0x364   :  { %2226 = vmatpush.bf16.msrb.mxu3 %v3848_v23 }
 0x366   :  { %v1149_v50 = vpop.f32.mrf.mxu0  ;;  %v1261_v51 = vld [vmem:[#allocation2 + $0x30] sm:$0xf]  ;;  %v1262_v52 = vld [vmem:[#allocation2 + $0x34] sm:$0xf] }
 0x367   :  { %v1150_v54 = vadd.f32 %v4359_v29, %v1149_v50  ;;  %1406 = vst [vmem:[#allocation3 + $0x64] sm:$0xf] %v1261_v51  ;;  %v3775_v21 = vld [vmem:[#allocation2 + $0x30] sm:$0xff]  ;;  %v3774_v29 = vld [vmem:[#allocation2 + $0x28] sm:$0xff] }
 0x368   :  { %1407 = vst [vmem:[#allocation3 + $0x6c] sm:$0xf] %v1262_v52  ;;  %2227 = vmatpush.bf16.msrb.mxu3 %v3847_v25 }
 0x369   :  { %v1199_v56 = vadd.f32 %v1198_v55, %v1150_v54 }
 0x36b   :  { %v1216_v16 = vmax.f32 %v1199_v56, 0.0 }
 0x36d   :  { %v3967_v58 = vpack.c.bf16 %v1216_v16, %v1215_v57 }
 0x36e   :  { %v3789_v18 = vld [vmem:[#allocation3 + $0x64] sm:$0xf] }
 0x36f   :  { %4062 = vst [vmem:[#allocation2 + $0x38] sm:$0xff] %v3967_v58   ;;  %v3285_v59 = vld [vmem:[#allocation3 + $0x68] sm:$0xf0] }
 0x370   :  { %v3288_v60 = vor.u32 %v3789_v18, %v3285_v59 }
 0x372   :  { %1727 = vmatmul.bf16.gmra.mxu0 %v3288_v60 }
 0x376   :  { %v3776_v17 = vld [vmem:[#allocation2 + $0x38] sm:$0xff] }
 0x377   :  { %v1263_v19 = vld [vmem:[#allocation2 + $0x38] sm:$0xf]  ;;  %v1264_v20 = vld [vmem:[#allocation2 + $0x3c] sm:$0xf]  ;;  %1313 = vmatpush.bf16.msrb.mxu2 %v3776_v17 }
 0x378   :  { %1408 = vst [vmem:[#allocation3 + $0x74] sm:$0xf] %v1263_v19 }
 0x379   :  { %1409 = vst [vmem:[#allocation3 + $0x7c] sm:$0xf] %v1264_v20 }
 0x37b   :  { %1314 = vmatpush.bf16.msrb.mxu2 %v3775_v21 }
 0x37f   :  { %v3791_v61 = vld [vmem:[#allocation3 + $0x74] sm:$0xf]  ;;  %1315 = vmatpush.bf16.msrb.mxu2 %v3774_v29 }
 0x380   :  { %v3293_v62 = vld [vmem:[#allocation3 + $0x78] sm:$0xf0] }
 0x381   :  { %v3296_v63 = vor.u32 %v3791_v61, %v3293_v62 }
 0x383   :  { %1732 = vmatmul.bf16.gmra.mxu0 %v3296_v63  ;;  %1316 = vmatpush.bf16.msrb.mxu2 %v3773_v0 }
 0x387   :  { %1317 = vmatpush.bf16.msrb.mxu2 %v3772_v1 }
 0x38b   :  { %1318 = vmatpush.bf16.msrb.mxu2 %v3771_v2 }
 0x38f   :  { %1319 = vmatpush.bf16.msrb.mxu2 %v3770_v3  ;;  %v1698_v22 = vpop.f32.mrf.mxu0 }
 0x393   :  { %1320 = vmatpush.bf16.msrb.mxu2 %v3769_v4 }
 0x396   :  { %1321 = vmatmul.bf16.vlgmr.msrb.gmra.mxu2 %v4377_v5 }
 0x3a6   :  { %1326 = vmatmul.bf16.gmra.mxu2 %v4380_v30 }
 0x3b6   :  { %1331 = vmatmul.bf16.gmra.mxu2 %v4383_v6 }
 0x3c6   :  { %1336 = vmatmul.bf16.gmra.mxu2 %v4386_v7 }
 0x3d6   :  { %1341 = vmatmul.bf16.gmra.mxu2 %v4389_v8 }
 0x3e6   :  { %1346 = vmatmul.bf16.gmra.mxu2 %v4392_v9 }
 0x3f6   :  { %1351 = vmatmul.bf16.gmra.mxu2 %v4395_v13 }
 0x406   :  { %1356 = vmatmul.bf16.gmra.mxu2 %v4398_v24 }
 0x419   :  { %v1322_v26 = vpop.f32.mrf.mxu2 }
 0x41a   :  { %v1362_v27 = vpack.c.bf16 %v1322_v26, %v1322_v26 }
 0x41c   :  { %1378 = vst [vmem:[#allocation3] sm:$0xf] %v1362_v27 }
 0x421   :  { %v1324_v28 = vpop.f32.mrf.mxu2 }
 0x422   :  { %v1363_v32 = vpack.c.bf16 %v1324_v28, %v1324_v28 }
 0x423   :  { %v3235_v35 = vld [vmem:[#allocation3] sm:$0xf] }
 0x424   :  { %1379 = vst [vmem:[#allocation3 + $0x8] sm:$0xf] %v1363_v32  ;;  %v3846_v32 = vld [vmem:[#allocation9 + $0x1e8] sm:$0xff] }
 0x425   :  { %2228 = vmatpush.bf16.msrb.mxu3 %v3846_v32 }
 0x429   :  { %v1327_v33 = vpop.f32.mrf.mxu2 }
 0x42a   :  { %v1364_v34 = vpack.c.bf16 %v1327_v33, %v1327_v33  ;;  %v1700_v33 = vpop.f32.mrf.mxu0 }
 0x42b   :  { %v3778_v36 = vld [vmem:[#allocation3 + $0x4] sm:$0xf0] }
 0x42c   :  { %1380 = vst [vmem:[#allocation3 + $0x10] sm:$0xf] %v1364_v34  ;;  %v3236_v37 = vor.u32 %v3778_v36, %v3235_v35  ;;  %v3845_v34 = vld [vmem:[#allocation9 + $0x1e0] sm:$0xff]  ;;  %v3844_v35 = vld [vmem:[#allocation9 + $0x1d8] sm:$0xff] }
 0x42d   :  { %2229 = vmatpush.bf16.msrb.mxu3 %v3845_v34 }
 0x42e   :  { %1648 = vmatmul.bf16.vlgmr.msra.gmra.mxu3 %v3236_v37  ;;  %v3843_v37 = vld [vmem:[#allocation9 + $0x1d0] sm:$0xff] }
 0x431   :  { %v1329_v38 = vpop.f32.mrf.mxu2  ;;  %2230 = vmatpush.bf16.msrb.mxu3 %v3844_v35 }
 0x432   :  { %v1365_v40 = vpack.c.bf16 %v1329_v38, %v1329_v38  ;;  %v1703_v36 = vpop.f32.mrf.mxu0  ;;  %v3842_v38 = vld [vmem:[#allocation9 + $0x1c8] sm:$0xff] }
 0x433   :  { %v3243_v41 = vld [vmem:[#allocation3 + $0x10] sm:$0xf] }
 0x434   :  { %1381 = vst [vmem:[#allocation3 + $0x18] sm:$0xf] %v1365_v40 }
 0x435   :  { %2231 = vmatpush.bf16.msrb.mxu3 %v3843_v37 }
 0x439   :  { %v1332_v31 = vpop.f32.mrf.mxu2  ;;  %2232 = vmatpush.bf16.msrb.mxu3 %v3842_v38 }
 0x43a   :  { %v1366_v39 = vpack.c.bf16 %v1332_v31, %v1332_v31  ;;  %v3841_v31 = vld [vmem:[#allocation9 + $0x1c0] sm:$0xff] }
 0x43b   :  { %v3780_v42 = vld [vmem:[#allocation3 + $0x14] sm:$0xf0] }
 0x43c   :  { %1382 = vst [vmem:[#allocation3 + $0x20] sm:$0xf] %v1366_v39  ;;  %v3244_v43 = vor.u32 %v3780_v42, %v3243_v41  ;;  %v4401_v39 = vld [vmem:[#allocation10 + $0x2] ss:$0 sm:$0xff]  ;;  %v1705_v41 = vpop.f32.mrf.mxu0 }
 0x43d   :  { %2233 = vmatpush.bf16.msrb.mxu3 %v3841_v31 }
 0x43e   :  { %1653 = vmatmul.bf16.gmra.mxu3 %v3244_v43 }
 0x441   :  { %v1334_v44 = vpop.f32.mrf.mxu2 }
 0x442   :  { %v1367_v45 = vpack.c.bf16 %v1334_v44, %v1334_v44 }
 0x443   :  { %v3251_v48 = vld [vmem:[#allocation3 + $0x20] sm:$0xf] }
 0x444   :  { %1383 = vst [vmem:[#allocation3 + $0x28] sm:$0xf] %v1367_v45 }
 0x449   :  { %v1337_v46 = vpop.f32.mrf.mxu2 }
 0x44a   :  { %v1368_v47 = vpack.c.bf16 %v1337_v46, %v1337_v46 }
 0x44b   :  { %v3782_v49 = vld [vmem:[#allocation3 + $0x24] sm:$0xf0] }
 0x44c   :  { %1384 = vst [vmem:[#allocation3 + $0x30] sm:$0xf] %v1368_v47  ;;  %v3252_v50 = vor.u32 %v3782_v49, %v3251_v48  ;;  %v1708_v47 = vpop.f32.mrf.mxu0 }
 0x44e   :  { %1658 = vmatmul.bf16.gmra.mxu3 %v3252_v50 }
 0x451   :  { %v1339_v51 = vpop.f32.mrf.mxu2 }
 0x452   :  { %v1369_v52 = vpack.c.bf16 %v1339_v51, %v1339_v51 }
 0x453   :  { %v3259_v55 = vld [vmem:[#allocation3 + $0x30] sm:$0xf] }
 0x454   :  { %1385 = vst [vmem:[#allocation3 + $0x38] sm:$0xf] %v1369_v52 }
 0x459   :  { %v1342_v53 = vpop.f32.mrf.mxu2 }
 0x45a   :  { %v1370_v54 = vpack.c.bf16 %v1342_v53, %v1342_v53  ;;  %v1710_v53 = vpop.f32.mrf.mxu0 }
 0x45b   :  { %v3784_v56 = vld [vmem:[#allocation3 + $0x34] sm:$0xf0] }
 0x45c   :  { %1386 = vst [vmem:[#allocation3 + $0x40] sm:$0xf] %v1370_v54  ;;  %v3260_v57 = vor.u32 %v3784_v56, %v3259_v55 }
 0x45e   :  { %1663 = vmatmul.bf16.gmra.mxu3 %v3260_v57 }
 0x461   :  { %v1344_v16 = vpop.f32.mrf.mxu2 }
 0x462   :  { %v1371_v58 = vpack.c.bf16 %v1344_v16, %v1344_v16 }
 0x463   :  { %v3267_v60 = vld [vmem:[#allocation3 + $0x40] sm:$0xf] }
 0x464   :  { %1387 = vst [vmem:[#allocation3 + $0x48] sm:$0xf] %v1371_v58 }
 0x469   :  { %v1347_v18 = vpop.f32.mrf.mxu2 }
 0x46a   :  { %v1372_v59 = vpack.c.bf16 %v1347_v18, %v1347_v18 }
 0x46b   :  { %v3786_v17 = vld [vmem:[#allocation3 + $0x44] sm:$0xf0] }
 0x46c   :  { %1388 = vst [vmem:[#allocation3 + $0x50] sm:$0xf] %v1372_v59  ;;  %v3268_v19 = vor.u32 %v3786_v17, %v3267_v60  ;;  %v1713_v17 = vpop.f32.mrf.mxu0 }
 0x46e   :  { %1668 = vmatmul.bf16.gmra.mxu3 %v3268_v19 }
 0x471   :  { %v1349_v20 = vpop.f32.mrf.mxu2 }
 0x472   :  { %v1373_v21 = vpack.c.bf16 %v1349_v20, %v1349_v20 }
 0x473   :  { %v3275_v62 = vld [vmem:[#allocation3 + $0x50] sm:$0xf] }
 0x474   :  { %1389 = vst [vmem:[#allocation3 + $0x58] sm:$0xf] %v1373_v21 }
 0x479   :  { %v1352_v29 = vpop.f32.mrf.mxu2 }
 0x47a   :  { %v1374_v61 = vpack.c.bf16 %v1352_v29, %v1352_v29 }
 0x47b   :  { %v3788_v63 = vld [vmem:[#allocation3 + $0x54] sm:$0xf0] }
 0x47c   :  { %1390 = vst [vmem:[#allocation3 + $0x60] sm:$0xf] %v1374_v61  ;;  %v3276_v0 = vor.u32 %v3788_v63, %v3275_v62 }
 0x47e   :  { %1673 = vmatmul.bf16.gmra.mxu3 %v3276_v0 }
 0x481   :  { %v1354_v1 = vpop.f32.mrf.mxu2 }
 0x482   :  { %v1375_v2 = vpack.c.bf16 %v1354_v1, %v1354_v1 }
 0x483   :  { %v3283_v10 = vld [vmem:[#allocation3 + $0x60] sm:$0xf] }
 0x484   :  { %1391 = vst [vmem:[#allocation3 + $0x68] sm:$0xf] %v1375_v2 }
 0x489   :  { %v1357_v3 = vpop.f32.mrf.mxu2 }
 0x48a   :  { %v1376_v4 = vpack.c.bf16 %v1357_v3, %v1357_v3  ;;  %v1715_v3 = vpop.f32.mrf.mxu0 }
 0x48b   :  { %v3790_v11 = vld [vmem:[#allocation3 + $0x64] sm:$0xf0] }
 0x48c   :  { %1392 = vst [vmem:[#allocation3 + $0x70] sm:$0xf] %v1376_v4  ;;  %v3284_v12 = vor.u32 %v3790_v11, %v3283_v10 }
 0x48e   :  { %1678 = vmatmul.bf16.gmra.mxu3 %v3284_v12 }
 0x491   :  { %v1359_v14 = vpop.f32.mrf.mxu2 }
 0x492   :  { %v1377_v15 = vpack.c.bf16 %v1359_v14, %v1359_v14  ;;  %v1718_v25 = vpop.f32.mrf.mxu0 }
 0x493   :  { %v3291_v26 = vld [vmem:[#allocation3 + $0x70] sm:$0xf] }
 0x494   :  { %1393 = vst [vmem:[#allocation3 + $0x78] sm:$0xf] %v1377_v15 }
 0x49a   :  { %v1720_v38 = vpop.f32.mrf.mxu0 }
 0x49b   :  { %v3792_v27 = vld [vmem:[#allocation3 + $0x74] sm:$0xf0] }
 0x49c   :  { %v3292_v28 = vor.u32 %v3792_v27, %v3291_v26 }
 0x49e   :  { %1683 = vmatmul.bf16.gmra.mxu3 %v3292_v28 }
 0x4b1   :  { %v1649_v40 = vpop.f32.mrf.mxu3 }
 0x4b2   :  { %v1650_v42 = vadd.f32 %v4401_v39, %v1649_v40 }
 0x4b4   :  { %v1699_v44 = vadd.f32 %v1698_v22, %v1650_v42 }
 0x4b6   :  { %v1738_v48 = vmax.f32 %v1699_v44, 0.0 }
 0x4b9   :  { %v1651_v43 = vpop.f32.mrf.mxu3 }
 0x4ba   :  { %v1652_v45 = vadd.f32 %v4401_v39, %v1651_v43 }
 0x4bc   :  { %v1701_v46 = vadd.f32 %v1700_v33, %v1652_v45  ;;  %v1723_v45 = vpop.f32.mrf.mxu0 }
 0x4be   :  { %v1739_v49 = vmax.f32 %v1701_v46, 0.0 }
 0x4c0   :  { %v3972_v50 = vpack.c.bf16 %v1739_v49, %v1738_v48 }
 0x4c1   :  { %v1654_v51 = vpop.f32.mrf.mxu3 }
 0x4c2   :  { %3973 = vst [vmem:[#allocation2] sm:$0xff] %v3972_v50   ;;  %v1655_v52 = vadd.f32 %v4401_v39, %v1654_v51 }
 0x4c4   :  { %v1704_v57 = vadd.f32 %v1703_v36, %v1655_v52 }
 0x4c6   :  { %v1740_v18 = vmax.f32 %v1704_v57, 0.0 }
 0x4c9   :  { %v1656_v54 = vpop.f32.mrf.mxu3  ;;  %v1786_v55 = vld [vmem:[#allocation2] sm:$0xf]  ;;  %v1787_v56 = vld [vmem:[#allocation2 + $0x4] sm:$0xf] }
 0x4ca   :  { %v1657_v16 = vadd.f32 %v4401_v39, %v1656_v54  ;;  %1931 = vst [vmem:[#allocation3 + $0x4] sm:$0xf] %v1786_v55 }
 0x4cb   :  { %1932 = vst [vmem:[#allocation3 + $0xc] sm:$0xf] %v1787_v56 }
 0x4cc   :  { %v1706_v58 = vadd.f32 %v1705_v41, %v1657_v16  ;;  %v1725_v16 = vpop.f32.mrf.mxu0 }
 0x4ce   :  { %v1741_v59 = vmax.f32 %v1706_v58, 0.0 }
 0x4d0   :  { %v3977_v60 = vpack.c.bf16 %v1741_v59, %v1740_v18 }
 0x4d1   :  { %v1659_v19 = vpop.f32.mrf.mxu3  ;;  %v3817_v20 = vld [vmem:[#allocation3 + $0x4] sm:$0xf] }
 0x4d2   :  { %4063 = vst [vmem:[#allocation2 + $0x8] sm:$0xff] %v3977_v60   ;;  %v3397_v21 = vld [vmem:[#allocation3 + $0x8] sm:$0xf0]  ;;  %v1660_v61 = vadd.f32 %v4401_v39, %v1659_v19 }
 0x4d3   :  { %v3400_v29 = vor.u32 %v3817_v20, %v3397_v21 }
 0x4d4   :  { %v1709_v1 = vadd.f32 %v1708_v47, %v1660_v61 }
 0x4d5   :  { %2234 = vmatmul.bf16.vlgmr.msrb.gmra.mxu3 %v3400_v29  ;;  %v1728_v29 = vpop.f32.mrf.mxu0 }
 0x4d6   :  { %v1742_v10 = vmax.f32 %v1709_v1, 0.0 }
 0x4d9   :  { %v1661_v62 = vpop.f32.mrf.mxu3  ;;  %v1788_v63 = vld [vmem:[#allocation2 + $0x8] sm:$0xf]  ;;  %v1789_v0 = vld [vmem:[#allocation2 + $0xc] sm:$0xf] }
 0x4da   :  { %v1662_v2 = vadd.f32 %v4401_v39, %v1661_v62  ;;  %1933 = vst [vmem:[#allocation3 + $0x14] sm:$0xf] %v1788_v63 }
 0x4db   :  { %1934 = vst [vmem:[#allocation3 + $0x1c] sm:$0xf] %v1789_v0 }
 0x4dc   :  { %v1711_v4 = vadd.f32 %v1710_v53, %v1662_v2 }
 0x4de   :  { %v1743_v11 = vmax.f32 %v1711_v4, 0.0 }
 0x4e0   :  { %v3982_v12 = vpack.c.bf16 %v1743_v11, %v1742_v10  ;;  %v1730_v10 = vpop.f32.mrf.mxu0 }
 0x4e1   :  { %v1664_v14 = vpop.f32.mrf.mxu3  ;;  %v3819_v15 = vld [vmem:[#allocation3 + $0x14] sm:$0xf] }
 0x4e2   :  { %4064 = vst [vmem:[#allocation2 + $0x10] sm:$0xff] %v3982_v12   ;;  %v3405_v22 = vld [vmem:[#allocation3 + $0x18] sm:$0xf0]  ;;  %v1665_v26 = vadd.f32 %v4401_v39, %v1664_v14 }
 0x4e3   :  { %v3408_v23 = vor.u32 %v3819_v15, %v3405_v22 }
 0x4e4   :  { %v1714_v33 = vadd.f32 %v1713_v17, %v1665_v26 }
 0x4e5   :  { %2239 = vmatmul.bf16.gmra.mxu3 %v3408_v23 }
 0x4e6   :  { %v1744_v36 = vmax.f32 %v1714_v33, 0.0 }
 0x4e9   :  { %v1666_v27 = vpop.f32.mrf.mxu3  ;;  %v1790_v28 = vld [vmem:[#allocation2 + $0x10] sm:$0xf]  ;;  %v1791_v32 = vld [vmem:[#allocation2 + $0x14] sm:$0xf] }
 0x4ea   :  { %v1667_v34 = vadd.f32 %v4401_v39, %v1666_v27  ;;  %1935 = vst [vmem:[#allocation3 + $0x24] sm:$0xf] %v1790_v28  ;;  %v1733_v28 = vpop.f32.mrf.mxu0 }
 0x4eb   :  { %1936 = vst [vmem:[#allocation3 + $0x2c] sm:$0xf] %v1791_v32 }
 0x4ec   :  { %v1716_v35 = vadd.f32 %v1715_v3, %v1667_v34 }
 0x4ee   :  { %v1745_v37 = vmax.f32 %v1716_v35, 0.0 }
 0x4f0   :  { %v3987_v40 = vpack.c.bf16 %v1745_v37, %v1744_v36 }
 0x4f1   :  { %v1669_v31 = vpop.f32.mrf.mxu3  ;;  %v3821_v41 = vld [vmem:[#allocation3 + $0x24] sm:$0xf] }
 0x4f2   :  { %4065 = vst [vmem:[#allocation2 + $0x18] sm:$0xff] %v3987_v40   ;;  %v3413_v42 = vld [vmem:[#allocation3 + $0x28] sm:$0xf0]  ;;  %v1670_v44 = vadd.f32 %v4401_v39, %v1669_v31 }
 0x4f3   :  { %v3416_v43 = vor.u32 %v3821_v41, %v3413_v42  ;;  %v1735_v42 = vpop.f32.mrf.mxu0 }
 0x4f4   :  { %v1719_v49 = vadd.f32 %v1718_v25, %v1670_v44 }
 0x4f5   :  { %2244 = vmatmul.bf16.gmra.mxu3 %v3416_v43 }
 0x4f6   :  { %v1746_v52 = vmax.f32 %v1719_v49, 0.0 }
 0x4f9   :  { %v1671_v46 = vpop.f32.mrf.mxu3  ;;  %v1792_v47 = vld [vmem:[#allocation2 + $0x18] sm:$0xf]  ;;  %v1793_v48 = vld [vmem:[#allocation2 + $0x1c] sm:$0xf] }
 0x4fa   :  { %v1672_v50 = vadd.f32 %v4401_v39, %v1671_v46  ;;  %1937 = vst [vmem:[#allocation3 + $0x34] sm:$0xf] %v1792_v47 }
 0x4fb   :  { %1938 = vst [vmem:[#allocation3 + $0x3c] sm:$0xf] %v1793_v48 }
 0x4fc   :  { %v1721_v51 = vadd.f32 %v1720_v38, %v1672_v50 }
 0x4fe   :  { %v1747_v53 = vmax.f32 %v1721_v51, 0.0 }
 0x500   :  { %v3992_v54 = vpack.c.bf16 %v1747_v53, %v1746_v52 }
 0x501   :  { %v1674_v55 = vpop.f32.mrf.mxu3  ;;  %v3823_v56 = vld [vmem:[#allocation3 + $0x34] sm:$0xf] }
 0x502   :  { %4066 = vst [vmem:[#allocation2 + $0x20] sm:$0xff] %v3992_v54   ;;  %v3421_v57 = vld [vmem:[#allocation3 + $0x38] sm:$0xf0]  ;;  %v1675_v18 = vadd.f32 %v4401_v39, %v1674_v55 }
 0x503   :  { %v3424_v58 = vor.u32 %v3823_v56, %v3421_v57 }
 0x504   :  { %v1724_v19 = vadd.f32 %v1723_v45, %v1675_v18  ;;  %v3810_v18 = vld [vmem:[#allocation2 + $0x8] sm:$0xff] }
 0x505   :  { %2249 = vmatmul.bf16.gmra.mxu3 %v3424_v58  ;;  %v3811_v58 = vld [vmem:[#allocation2 + $0x10] sm:$0xff] }
 0x506   :  { %v1748_v61 = vmax.f32 %v1724_v19, 0.0  ;;  %v3838_v19 = vld [vmem:[#allocation9 + $0x1a8] sm:$0xff] }
 0x509   :  { %v1676_v59 = vpop.f32.mrf.mxu3  ;;  %v1794_v60 = vld [vmem:[#allocation2 + $0x20] sm:$0xf]  ;;  %v1795_v17 = vld [vmem:[#allocation2 + $0x24] sm:$0xf] }
 0x50a   :  { %v1677_v20 = vadd.f32 %v4401_v39, %v1676_v59  ;;  %1939 = vst [vmem:[#allocation3 + $0x44] sm:$0xf] %v1794_v60  ;;  %v3813_v57 = vld [vmem:[#allocation2 + $0x20] sm:$0xff]  ;;  %v3840_v60 = vld [vmem:[#allocation9 + $0x1b8] sm:$0xff] }
 0x50b   :  { %1940 = vst [vmem:[#allocation3 + $0x4c] sm:$0xf] %v1795_v17  ;;  %v3809_v59 = vld [vmem:[#allocation2] sm:$0xff]  ;;  %2177 = vmatpush.bf16.msra.mxu2 %v3840_v60  ;;  %v3839_v17 = vld [vmem:[#allocation9 + $0x1b0] sm:$0xff] }
 0x50c   :  { %v1726_v21 = vadd.f32 %v1725_v16, %v1677_v20  ;;  %v3812_v16 = vld [vmem:[#allocation2 + $0x18] sm:$0xff]  ;;  %v3837_v20 = vld [vmem:[#allocation9 + $0x1a0] sm:$0xff] }
 0x50e   :  { %v1749_v62 = vmax.f32 %v1726_v21, 0.0 }
 0x50f   :  { %2178 = vmatpush.bf16.msra.mxu2 %v3839_v17 }
 0x510   :  { %v3997_v63 = vpack.c.bf16 %v1749_v62, %v1748_v61 }
 0x511   :  { %v1679_v0 = vpop.f32.mrf.mxu3  ;;  %v3825_v1 = vld [vmem:[#allocation3 + $0x44] sm:$0xf] }
 0x512   :  { %4067 = vst [vmem:[#allocation2 + $0x28] sm:$0xff] %v3997_v63   ;;  %v3429_v2 = vld [vmem:[#allocation3 + $0x48] sm:$0xf0]  ;;  %v1680_v4 = vadd.f32 %v4401_v39, %v1679_v0 }
 0x513   :  { %v3432_v3 = vor.u32 %v3825_v1, %v3429_v2  ;;  %2179 = vmatpush.bf16.msra.mxu2 %v3838_v19 }
 0x514   :  { %v1729_v15 = vadd.f32 %v1728_v29, %v1680_v4 }
 0x515   :  { %2254 = vmatmul.bf16.gmra.mxu3 %v3432_v3 }
 0x516   :  { %v1750_v25 = vmax.f32 %v1729_v15, 0.0 }
 0x517   :  { %2180 = vmatpush.bf16.msra.mxu2 %v3837_v20  ;;  %v3886_v20 = vld [vmem:[#allocation9 + $0x268] sm:$0xff] }
 0x519   :  { %v1681_v11 = vpop.f32.mrf.mxu3  ;;  %v1796_v12 = vld [vmem:[#allocation2 + $0x28] sm:$0xf]  ;;  %v1797_v14 = vld [vmem:[#allocation2 + $0x2c] sm:$0xf] }
 0x51a   :  { %v1682_v22 = vadd.f32 %v4401_v39, %v1681_v11  ;;  %1941 = vst [vmem:[#allocation3 + $0x54] sm:$0xf] %v1796_v12 }
 0x51b   :  { %1942 = vst [vmem:[#allocation3 + $0x5c] sm:$0xf] %v1797_v14 }
 0x51c   :  { %v1731_v23 = vadd.f32 %v1730_v10, %v1682_v22 }
 0x51e   :  { %v1751_v26 = vmax.f32 %v1731_v23, 0.0 }
 0x520   :  { %v4002_v27 = vpack.c.bf16 %v1751_v26, %v1750_v25 }
 0x521   :  { %v1684_v32 = vpop.f32.mrf.mxu3  ;;  %v3827_v33 = vld [vmem:[#allocation3 + $0x54] sm:$0xf] }
 0x522   :  { %4068 = vst [vmem:[#allocation2 + $0x30] sm:$0xff] %v4002_v27   ;;  %v3437_v34 = vld [vmem:[#allocation3 + $0x58] sm:$0xf0]  ;;  %v1685_v36 = vadd.f32 %v4401_v39, %v1684_v32 }
 0x523   :  { %v3440_v35 = vor.u32 %v3827_v33, %v3437_v34 }
 0x524   :  { %v1734_v31 = vadd.f32 %v1733_v28, %v1685_v36 }
 0x525   :  { %2259 = vmatmul.bf16.gmra.mxu3 %v3440_v35 }
 0x526   :  { %v1752_v44 = vmax.f32 %v1734_v31, 0.0 }
 0x529   :  { %v1686_v37 = vpop.f32.mrf.mxu3  ;;  %v1798_v38 = vld [vmem:[#allocation2 + $0x30] sm:$0xf]  ;;  %v1799_v40 = vld [vmem:[#allocation2 + $0x34] sm:$0xf] }
 0x52a   :  { %v1687_v41 = vadd.f32 %v4401_v39, %v1686_v37  ;;  %1943 = vst [vmem:[#allocation3 + $0x64] sm:$0xf] %v1798_v38  ;;  %v3815_v53 = vld [vmem:[#allocation2 + $0x30] sm:$0xff]  ;;  %v3814_v39 = vld [vmem:[#allocation2 + $0x28] sm:$0xff] }
 0x52b   :  { %1944 = vst [vmem:[#allocation3 + $0x6c] sm:$0xf] %v1799_v40 }
 0x52c   :  { %v1736_v43 = vadd.f32 %v1735_v42, %v1687_v41 }
 0x52e   :  { %v1753_v45 = vmax.f32 %v1736_v43, 0.0 }
 0x530   :  { %v4007_v46 = vpack.c.bf16 %v1753_v45, %v1752_v44 }
 0x531   :  { %v3829_v47 = vld [vmem:[#allocation3 + $0x64] sm:$0xf] }
 0x532   :  { %4069 = vst [vmem:[#allocation2 + $0x38] sm:$0xff] %v4007_v46   ;;  %v3445_v48 = vld [vmem:[#allocation3 + $0x68] sm:$0xf0] }
 0x533   :  { %v3448_v49 = vor.u32 %v3829_v47, %v3445_v48 }
 0x535   :  { %2264 = vmatmul.bf16.gmra.mxu3 %v3448_v49 }
 0x539   :  { %v3816_v50 = vld [vmem:[#allocation2 + $0x38] sm:$0xff] }
 0x53a   :  { %v1800_v51 = vld [vmem:[#allocation2 + $0x38] sm:$0xf]  ;;  %v1801_v52 = vld [vmem:[#allocation2 + $0x3c] sm:$0xf]  ;;  %1850 = vmatpush.bf16.msra.mxu1 %v3816_v50 }
 0x53b   :  { %1945 = vst [vmem:[#allocation3 + $0x74] sm:$0xf] %v1800_v51 }
 0x53c   :  { %1946 = vst [vmem:[#allocation3 + $0x7c] sm:$0xf] %v1801_v52 }
 0x53e   :  { %1851 = vmatpush.bf16.msra.mxu1 %v3815_v53 }
 0x542   :  { %v3831_v54 = vld [vmem:[#allocation3 + $0x74] sm:$0xf]  ;;  %1852 = vmatpush.bf16.msra.mxu1 %v3814_v39 }
 0x543   :  { %v3453_v55 = vld [vmem:[#allocation3 + $0x78] sm:$0xf0] }
 0x544   :  { %v3456_v56 = vor.u32 %v3831_v54, %v3453_v55 }
 0x546   :  { %2269 = vmatmul.bf16.gmra.mxu3 %v3456_v56  ;;  %1853 = vmatpush.bf16.msra.mxu1 %v3813_v57 }
 0x54a   :  { %1854 = vmatpush.bf16.msra.mxu1 %v3812_v16 }
 0x54e   :  { %1855 = vmatpush.bf16.msra.mxu1 %v3811_v58 }
 0x552   :  { %1856 = vmatpush.bf16.msra.mxu1 %v3810_v18  ;;  %v3888_v18 = vld [vmem:[#allocation9 + $0x278] sm:$0xff] }
 0x556   :  { %1857 = vmatpush.bf16.msra.mxu1 %v3809_v59  ;;  %v3887_v59 = vld [vmem:[#allocation9 + $0x270] sm:$0xff] }
 0x558   :  { %v2235_v58 = vpop.f32.mrf.mxu3 }
 0x559   :  { %1858 = vmatmul.bf16.vlgmr.msra.gmra.mxu1 %v4377_v5  ;;  %v3836_v5 = vld [vmem:[#allocation9 + $0x198] sm:$0xff] }
 0x55a   :  { %2181 = vmatpush.bf16.msra.mxu2 %v3836_v5 }
 0x560   :  { %v2237_v5 = vpop.f32.mrf.mxu3 }
 0x569   :  { %1863 = vmatmul.bf16.gmra.mxu1 %v4380_v30  ;;  %v3835_v30 = vld [vmem:[#allocation9 + $0x190] sm:$0xff] }
 0x56a   :  { %2182 = vmatpush.bf16.msra.mxu2 %v3835_v30  ;;  %v3885_v30 = vld [vmem:[#allocation9 + $0x260] sm:$0xff] }
 0x579   :  { %1868 = vmatmul.bf16.gmra.mxu1 %v4383_v6  ;;  %v3834_v6 = vld [vmem:[#allocation9 + $0x188] sm:$0xff] }
 0x57a   :  { %2183 = vmatpush.bf16.msra.mxu2 %v3834_v6  ;;  %v3884_v6 = vld [vmem:[#allocation9 + $0x258] sm:$0xff] }
 0x589   :  { %1873 = vmatmul.bf16.gmra.mxu1 %v4386_v7  ;;  %v3833_v7 = vld [vmem:[#allocation9 + $0x180] sm:$0xff] }
 0x58a   :  { %2184 = vmatpush.bf16.msra.mxu2 %v3833_v7  ;;  %v2240_v7 = vpop.f32.mrf.mxu3 }
 0x58e   :  { %2763 = vmatpush.bf16.msrb.mxu2 %v3888_v18 }
 0x592   :  { %2764 = vmatpush.bf16.msrb.mxu2 %v3887_v59 }
 0x596   :  { %2765 = vmatpush.bf16.msrb.mxu2 %v3886_v20 }
 0x599   :  { %1878 = vmatmul.bf16.gmra.mxu1 %v4389_v8 }
 0x59a   :  { %2766 = vmatpush.bf16.msrb.mxu2 %v3885_v30 }
 0x59e   :  { %2767 = vmatpush.bf16.msrb.mxu2 %v3884_v6 }
 0x5a9   :  { %1883 = vmatmul.bf16.gmra.mxu1 %v4392_v9 }
 0x5b9   :  { %1888 = vmatmul.bf16.gmra.mxu1 %v4395_v13 }
 0x5c9   :  { %1893 = vmatmul.bf16.gmra.mxu1 %v4398_v24 }
 0x5d6   :  { %v1859_v8 = vpop.f32.mrf.mxu1 }
 0x5d7   :  { %v1899_v9 = vpack.c.bf16 %v1859_v8, %v1859_v8  ;;  %v3883_v8 = vld [vmem:[#allocation9 + $0x250] sm:$0xff] }
 0x5d8   :  { %2768 = vmatpush.bf16.msrb.mxu2 %v3883_v8 }
 0x5d9   :  { %1915 = vst [vmem:[#allocation3] sm:$0xf] %v1899_v9  ;;  %v3882_v9 = vld [vmem:[#allocation9 + $0x248] sm:$0xff] }
 0x5dc   :  { %2769 = vmatpush.bf16.msrb.mxu2 %v3882_v9 }
 0x5de   :  { %v1861_v21 = vpop.f32.mrf.mxu1 }
 0x5df   :  { %v1900_v29 = vpack.c.bf16 %v1861_v21, %v1861_v21 }
 0x5e0   :  { %v3395_v13 = vld [vmem:[#allocation3] sm:$0xf] }
 0x5e1   :  { %1916 = vst [vmem:[#allocation3 + $0x8] sm:$0xf] %v1900_v29  ;;  %v3881_v29 = vld [vmem:[#allocation9 + $0x240] sm:$0xff] }
 0x5e2   :  { %2770 = vmatpush.bf16.msrb.mxu2 %v3881_v29 }
 0x5e6   :  { %v1864_v61 = vpop.f32.mrf.mxu1 }
 0x5e7   :  { %v1901_v62 = vpack.c.bf16 %v1864_v61, %v1864_v61  ;;  %v4427_v61 = vld [vmem:[#allocation10 + $0x3] ss:$0 sm:$0xff] }
 0x5e8   :  { %v3818_v63 = vld [vmem:[#allocation3 + $0x4] sm:$0xf0] }
 0x5e9   :  { %1917 = vst [vmem:[#allocation3 + $0x10] sm:$0xf] %v1901_v62  ;;  %v3396_v0 = vor.u32 %v3818_v63, %v3395_v13  ;;  %v2242_v62 = vpop.f32.mrf.mxu3 }
 0x5eb   :  { %2185 = vmatmul.bf16.vlgmr.msra.gmra.mxu2 %v3396_v0 }
 0x5ee   :  { %v1866_v1 = vpop.f32.mrf.mxu1 }
 0x5ef   :  { %v1902_v2 = vpack.c.bf16 %v1866_v1, %v1866_v1 }
 0x5f0   :  { %v3403_v24 = vld [vmem:[#allocation3 + $0x10] sm:$0xf] }
 0x5f1   :  { %1918 = vst [vmem:[#allocation3 + $0x18] sm:$0xf] %v1902_v2 }
 0x5f6   :  { %v1869_v3 = vpop.f32.mrf.mxu1 }
 0x5f7   :  { %v1903_v4 = vpack.c.bf16 %v1869_v3, %v1869_v3  ;;  %v2245_v3 = vpop.f32.mrf.mxu3 }
 0x5f8   :  { %v3820_v10 = vld [vmem:[#allocation3 + $0x14] sm:$0xf0] }
 0x5f9   :  { %1919 = vst [vmem:[#allocation3 + $0x20] sm:$0xf] %v1903_v4  ;;  %v3404_v11 = vor.u32 %v3820_v10, %v3403_v24 }
 0x5fb   :  { %2190 = vmatmul.bf16.gmra.mxu2 %v3404_v11 }
 0x5fe   :  { %v1871_v12 = vpop.f32.mrf.mxu1 }
 0x5ff   :  { %v1904_v14 = vpack.c.bf16 %v1871_v12, %v1871_v12 }
 0x600   :  { %v3411_v23 = vld [vmem:[#allocation3 + $0x20] sm:$0xf] }
 0x601   :  { %1920 = vst [vmem:[#allocation3 + $0x28] sm:$0xf] %v1904_v14  ;;  %v2247_v14 = vpop.f32.mrf.mxu3 }
 0x606   :  { %v1874_v15 = vpop.f32.mrf.mxu1 }
 0x607   :  { %v1905_v22 = vpack.c.bf16 %v1874_v15, %v1874_v15 }
 0x608   :  { %v3822_v25 = vld [vmem:[#allocation3 + $0x24] sm:$0xf0] }
 0x609   :  { %1921 = vst [vmem:[#allocation3 + $0x30] sm:$0xf] %v1905_v22  ;;  %v3412_v26 = vor.u32 %v3822_v25, %v3411_v23 }
 0x60b   :  { %2195 = vmatmul.bf16.gmra.mxu2 %v3412_v26 }
 0x60e   :  { %v1876_v27 = vpop.f32.mrf.mxu1 }
 0x60f   :  { %v1906_v28 = vpack.c.bf16 %v1876_v27, %v1876_v27 }
 0x610   :  { %v3419_v34 = vld [vmem:[#allocation3 + $0x30] sm:$0xf] }
 0x611   :  { %1922 = vst [vmem:[#allocation3 + $0x38] sm:$0xf] %v1906_v28 }
 0x616   :  { %v1879_v32 = vpop.f32.mrf.mxu1 }
 0x617   :  { %v1907_v33 = vpack.c.bf16 %v1879_v32, %v1879_v32 }
 0x618   :  { %v3824_v35 = vld [vmem:[#allocation3 + $0x34] sm:$0xf0] }
 0x619   :  { %1923 = vst [vmem:[#allocation3 + $0x40] sm:$0xf] %v1907_v33  ;;  %v3420_v36 = vor.u32 %v3824_v35, %v3419_v34  ;;  %v2250_v34 = vpop.f32.mrf.mxu3 }
 0x61b   :  { %2200 = vmatmul.bf16.gmra.mxu2 %v3420_v36 }
 0x61e   :  { %v1881_v37 = vpop.f32.mrf.mxu1 }
 0x61f   :  { %v1908_v38 = vpack.c.bf16 %v1881_v37, %v1881_v37 }
 0x620   :  { %v3427_v41 = vld [vmem:[#allocation3 + $0x40] sm:$0xf] }
 0x621   :  { %1924 = vst [vmem:[#allocation3 + $0x48] sm:$0xf] %v1908_v38 }
 0x626   :  { %v1884_v40 = vpop.f32.mrf.mxu1 }
 0x627   :  { %v1909_v31 = vpack.c.bf16 %v1884_v40, %v1884_v40 }
 0x628   :  { %v3826_v42 = vld [vmem:[#allocation3 + $0x44] sm:$0xf0] }
 0x629   :  { %1925 = vst [vmem:[#allocation3 + $0x50] sm:$0xf] %v1909_v31  ;;  %v3428_v43 = vor.u32 %v3826_v42, %v3427_v41 }
 0x62b   :  { %2205 = vmatmul.bf16.gmra.mxu2 %v3428_v43 }
 0x62e   :  { %v1886_v44 = vpop.f32.mrf.mxu1 }
 0x62f   :  { %v1910_v45 = vpack.c.bf16 %v1886_v44, %v1886_v44 }
 0x630   :  { %v3435_v48 = vld [vmem:[#allocation3 + $0x50] sm:$0xf] }
 0x631   :  { %1926 = vst [vmem:[#allocation3 + $0x58] sm:$0xf] %v1910_v45  ;;  %v2252_v45 = vpop.f32.mrf.mxu3 }
 0x636   :  { %v1889_v46 = vpop.f32.mrf.mxu1 }
 0x637   :  { %v1911_v47 = vpack.c.bf16 %v1889_v46, %v1889_v46 }
 0x638   :  { %v3828_v49 = vld [vmem:[#allocation3 + $0x54] sm:$0xf0] }
 0x639   :  { %1927 = vst [vmem:[#allocation3 + $0x60] sm:$0xf] %v1911_v47  ;;  %v3436_v50 = vor.u32 %v3828_v49, %v3435_v48 }
 0x63b   :  { %2210 = vmatmul.bf16.gmra.mxu2 %v3436_v50 }
 0x63e   :  { %v1891_v51 = vpop.f32.mrf.mxu1 }
 0x63f   :  { %v1912_v52 = vpack.c.bf16 %v1891_v51, %v1891_v51 }
 0x640   :  { %v3443_v54 = vld [vmem:[#allocation3 + $0x60] sm:$0xf] }
 0x641   :  { %1928 = vst [vmem:[#allocation3 + $0x68] sm:$0xf] %v1912_v52 }
 0x646   :  { %v1894_v53 = vpop.f32.mrf.mxu1 }
 0x647   :  { %v1913_v39 = vpack.c.bf16 %v1894_v53, %v1894_v53 }
 0x648   :  { %v3830_v55 = vld [vmem:[#allocation3 + $0x64] sm:$0xf0] }
 0x649   :  { %1929 = vst [vmem:[#allocation3 + $0x70] sm:$0xf] %v1913_v39  ;;  %v3444_v56 = vor.u32 %v3830_v55, %v3443_v54  ;;  %v2255_v39 = vpop.f32.mrf.mxu3 }
 0x64b   :  { %2215 = vmatmul.bf16.gmra.mxu2 %v3444_v56 }
 0x64e   :  { %v1896_v57 = vpop.f32.mrf.mxu1 }
 0x64f   :  { %v1914_v16 = vpack.c.bf16 %v1896_v57, %v1896_v57 }
 0x650   :  { %v3451_v60 = vld [vmem:[#allocation3 + $0x70] sm:$0xf] }
 0x651   :  { %1930 = vst [vmem:[#allocation3 + $0x78] sm:$0xf] %v1914_v16 }
 0x658   :  { %v3832_v17 = vld [vmem:[#allocation3 + $0x74] sm:$0xf0] }
 0x659   :  { %v3452_v19 = vor.u32 %v3832_v17, %v3451_v60  ;;  %v2257_v17 = vpop.f32.mrf.mxu3 }
 0x65b   :  { %2220 = vmatmul.bf16.gmra.mxu2 %v3452_v19 }
 0x661   :  { %v2260_v8 = vpop.f32.mrf.mxu3 }
 0x66e   :  { %v2186_v21 = vpop.f32.mrf.mxu2 }
 0x66f   :  { %v2187_v13 = vadd.f32 %v4427_v61, %v2186_v21 }
 0x671   :  { %v2236_v0 = vadd.f32 %v2235_v58, %v2187_v13 }
 0x673   :  { %v2275_v4 = vmax.f32 %v2236_v0, 0.0 }
 0x676   :  { %v2188_v63 = vpop.f32.mrf.mxu2 }
 0x677   :  { %v2189_v1 = vadd.f32 %v4427_v61, %v2188_v63 }
 0x679   :  { %v2238_v2 = vadd.f32 %v2237_v5, %v2189_v1 }
 0x67b   :  { %v2276_v24 = vmax.f32 %v2238_v2, 0.0 }
 0x67d   :  { %v4012_v10 = vpack.c.bf16 %v2276_v24, %v2275_v4 }
 0x67e   :  { %v2191_v11 = vpop.f32.mrf.mxu2 }
 0x67f   :  { %4013 = vst [vmem:[#allocation2] sm:$0xff] %v4012_v10   ;;  %v2192_v12 = vadd.f32 %v4427_v61, %v2191_v11  ;;  %v2262_v10 = vpop.f32.mrf.mxu3 }
 0x681   :  { %v2241_v25 = vadd.f32 %v2240_v7, %v2192_v12 }
 0x683   :  { %v2277_v28 = vmax.f32 %v2241_v25, 0.0 }
 0x686   :  { %v2193_v15 = vpop.f32.mrf.mxu2  ;;  %v2323_v22 = vld [vmem:[#allocation2] sm:$0xf]  ;;  %v2324_v23 = vld [vmem:[#allocation2 + $0x4] sm:$0xf] }
 0x687   :  { %v2194_v26 = vadd.f32 %v4427_v61, %v2193_v15  ;;  %2468 = vst [vmem:[#allocation3 + $0x4] sm:$0xf] %v2323_v22 }
 0x688   :  { %2469 = vst [vmem:[#allocation3 + $0xc] sm:$0xf] %v2324_v23 }
 0x689   :  { %v2243_v27 = vadd.f32 %v2242_v62, %v2194_v26 }
 0x68b   :  { %v2278_v32 = vmax.f32 %v2243_v27, 0.0  ;;  %v2265_v27 = vpop.f32.mrf.mxu3 }
 0x68d   :  { %v4017_v33 = vpack.c.bf16 %v2278_v32, %v2277_v28 }
 0x68e   :  { %v2196_v35 = vpop.f32.mrf.mxu2  ;;  %v3857_v36 = vld [vmem:[#allocation3 + $0x4] sm:$0xf] }
 0x68f   :  { %4070 = vst [vmem:[#allocation2 + $0x8] sm:$0xff] %v4017_v33   ;;  %v3557_v37 = vld [vmem:[#allocation3 + $0x8] sm:$0xf0]  ;;  %v2197_v40 = vadd.f32 %v4427_v61, %v2196_v35 }
 0x690   :  { %v3560_v38 = vor.u32 %v3857_v36, %v3557_v37 }
 0x691   :  { %v2246_v43 = vadd.f32 %v2245_v3, %v2197_v40 }
 0x692   :  { %2771 = vmatmul.bf16.vlgmr.msrb.gmra.mxu2 %v3560_v38 }
 0x693   :  { %v2279_v47 = vmax.f32 %v2246_v43, 0.0  ;;  %v2267_v40 = vpop.f32.mrf.mxu3 }
 0x696   :  { %v2198_v31 = vpop.f32.mrf.mxu2  ;;  %v2325_v41 = vld [vmem:[#allocation2 + $0x8] sm:$0xf]  ;;  %v2326_v42 = vld [vmem:[#allocation2 + $0xc] sm:$0xf] }
 0x697   :  { %v2199_v44 = vadd.f32 %v4427_v61, %v2198_v31  ;;  %2470 = vst [vmem:[#allocation3 + $0x14] sm:$0xf] %v2325_v41 }
 0x698   :  { %2471 = vst [vmem:[#allocation3 + $0x1c] sm:$0xf] %v2326_v42 }
 0x699   :  { %v2248_v46 = vadd.f32 %v2247_v14, %v2199_v44 }
 0x69b   :  { %v2280_v48 = vmax.f32 %v2248_v46, 0.0 }
 0x69d   :  { %v4022_v49 = vpack.c.bf16 %v2280_v48, %v2279_v47 }
 0x69e   :  { %v2201_v50 = vpop.f32.mrf.mxu2  ;;  %v3859_v51 = vld [vmem:[#allocation3 + $0x14] sm:$0xf] }
 0x69f   :  { %4071 = vst [vmem:[#allocation2 + $0x10] sm:$0xff] %v4022_v49   ;;  %v3565_v52 = vld [vmem:[#allocation3 + $0x18] sm:$0xf0]  ;;  %v2202_v54 = vadd.f32 %v4427_v61, %v2201_v50  ;;  %v2270_v49 = vpop.f32.mrf.mxu3 }
 0x6a0   :  { %v3568_v53 = vor.u32 %v3859_v51, %v3565_v52 }
 0x6a1   :  { %v2251_v16 = vadd.f32 %v2250_v34, %v2202_v54 }
 0x6a2   :  { %2776 = vmatmul.bf16.gmra.mxu2 %v3568_v53 }
 0x6a3   :  { %v2281_v59 = vmax.f32 %v2251_v16, 0.0 }
 0x6a6   :  { %v2203_v55 = vpop.f32.mrf.mxu2  ;;  %v2327_v56 = vld [vmem:[#allocation2 + $0x10] sm:$0xf]  ;;  %v2328_v57 = vld [vmem:[#allocation2 + $0x14] sm:$0xf] }
 0x6a7   :  { %v2204_v58 = vadd.f32 %v4427_v61, %v2203_v55  ;;  %2472 = vst [vmem:[#allocation3 + $0x24] sm:$0xf] %v2327_v56 }
 0x6a8   :  { %2473 = vst [vmem:[#allocation3 + $0x2c] sm:$0xf] %v2328_v57 }
 0x6a9   :  { %v2253_v18 = vadd.f32 %v2252_v45, %v2204_v58  ;;  %v2272_v58 = vpop.f32.mrf.mxu3 }
 0x6ab   :  { %v2282_v60 = vmax.f32 %v2253_v18, 0.0 }
 0x6ad   :  { %v4027_v19 = vpack.c.bf16 %v2282_v60, %v2281_v59 }
 0x6ae   :  { %v2206_v20 = vpop.f32.mrf.mxu2  ;;  %v3861_v5 = vld [vmem:[#allocation3 + $0x24] sm:$0xf] }
 0x6af   :  { %4072 = vst [vmem:[#allocation2 + $0x18] sm:$0xff] %v4027_v19   ;;  %v3573_v30 = vld [vmem:[#allocation3 + $0x28] sm:$0xf0]  ;;  %v2207_v7 = vadd.f32 %v4427_v61, %v2206_v20 }
 0x6b0   :  { %v3576_v6 = vor.u32 %v3861_v5, %v3573_v30 }
 0x6b1   :  { %v2256_v62 = vadd.f32 %v2255_v39, %v2207_v7 }
 0x6b2   :  { %2781 = vmatmul.bf16.gmra.mxu2 %v3576_v6 }
 0x6b3   :  { %v2283_v0 = vmax.f32 %v2256_v62, 0.0 }
 0x6b6   :  { %v2208_v9 = vpop.f32.mrf.mxu2  ;;  %v2329_v21 = vld [vmem:[#allocation2 + $0x18] sm:$0xf]  ;;  %v2330_v29 = vld [vmem:[#allocation2 + $0x1c] sm:$0xf] }
 0x6b7   :  { %v2209_v13 = vadd.f32 %v4427_v61, %v2208_v9  ;;  %2474 = vst [vmem:[#allocation3 + $0x34] sm:$0xf] %v2329_v21 }
 0x6b8   :  { %2475 = vst [vmem:[#allocation3 + $0x3c] sm:$0xf] %v2330_v29 }
 0x6b9   :  { %v2258_v63 = vadd.f32 %v2257_v17, %v2209_v13  ;;  %v3852_v13 = vld [vmem:[#allocation2 + $0x18] sm:$0xff] }
 0x6bb   :  { %v2284_v1 = vmax.f32 %v2258_v63, 0.0  ;;  %v3851_v63 = vld [vmem:[#allocation2 + $0x10] sm:$0xff] }
 0x6bd   :  { %v4032_v2 = vpack.c.bf16 %v2284_v1, %v2283_v0  ;;  %v3850_v0 = vld [vmem:[#allocation2 + $0x8] sm:$0xff]  ;;  %v3849_v1 = vld [vmem:[#allocation2] sm:$0xff] }
 0x6be   :  { %v2211_v3 = vpop.f32.mrf.mxu2  ;;  %v3863_v4 = vld [vmem:[#allocation3 + $0x34] sm:$0xf] }
 0x6bf   :  { %4073 = vst [vmem:[#allocation2 + $0x20] sm:$0xff] %v4032_v2   ;;  %v3581_v24 = vld [vmem:[#allocation3 + $0x38] sm:$0xf0]  ;;  %v2212_v12 = vadd.f32 %v4427_v61, %v2211_v3  ;;  %v4125_v2 = vld [vmem:[#allocation4] sm:$0xff]  ;;  %v4126_v3 = vld [vmem:[#allocation4 + $0x8] sm:$0xff] }
 0x6c0   :  { %v3584_v11 = vor.u32 %v3863_v4, %v3581_v24  ;;  %v4127_v4 = vld [vmem:[#allocation4 + $0x10] sm:$0xff]  ;;  %v4128_v24 = vld [vmem:[#allocation4 + $0x18] sm:$0xff] }
 0x6c1   :  { %v2261_v23 = vadd.f32 %v2260_v8, %v2212_v12  ;;  %v3880_v12 = vld [vmem:[#allocation9 + $0x238] sm:$0xff] }
 0x6c2   :  { %2786 = vmatmul.bf16.gmra.mxu2 %v3584_v11  ;;  %v4130_v11 = vld [vmem:[#allocation4 + $0x28] sm:$0xff]  ;;  %2714 = vmatpush.bf16.msrb.mxu1 %v3880_v12 }
 0x6c3   :  { %v2285_v28 = vmax.f32 %v2261_v23, 0.0  ;;  %v4131_v23 = vld [vmem:[#allocation4 + $0x30] sm:$0xff] }
 0x6c6   :  { %v2213_v14 = vpop.f32.mrf.mxu2  ;;  %v2331_v15 = vld [vmem:[#allocation2 + $0x20] sm:$0xf]  ;;  %v2332_v22 = vld [vmem:[#allocation2 + $0x24] sm:$0xf] }
 0x6c7   :  { %v2214_v25 = vadd.f32 %v4427_v61, %v2213_v14  ;;  %2476 = vst [vmem:[#allocation3 + $0x44] sm:$0xf] %v2331_v15  ;;  %v3853_v62 = vld [vmem:[#allocation2 + $0x20] sm:$0xff]  ;;  %v3879_v14 = vld [vmem:[#allocation9 + $0x230] sm:$0xff]  ;;  %v3878_v15 = vld [vmem:[#allocation9 + $0x228] sm:$0xff] }
 0x6c8   :  { %2477 = vst [vmem:[#allocation3 + $0x4c] sm:$0xf] %v2332_v22  ;;  %2715 = vmatpush.bf16.msrb.mxu1 %v3879_v14  ;;  %v3877_v22 = vld [vmem:[#allocation9 + $0x220] sm:$0xff] }
 0x6c9   :  { %v2263_v26 = vadd.f32 %v2262_v10, %v2214_v25  ;;  %v4129_v10 = vld [vmem:[#allocation4 + $0x20] sm:$0xff]  ;;  %v3876_v25 = vld [vmem:[#allocation9 + $0x218] sm:$0xff] }
 0x6cb   :  { %v2286_v32 = vmax.f32 %v2263_v26, 0.0  ;;  %v3875_v26 = vld [vmem:[#allocation9 + $0x210] sm:$0xff] }
 0x6cc   :  { %2716 = vmatpush.bf16.msrb.mxu1 %v3878_v15 }
 0x6cd   :  { %v4037_v33 = vpack.c.bf16 %v2286_v32, %v2285_v28  ;;  %v3873_v28 = vld [vmem:[#allocation9 + $0x200] sm:$0xff]  ;;  %v4132_v32 = vld [vmem:[#allocation4 + $0x38] sm:$0xff] }
 0x6ce   :  { %v2216_v34 = vpop.f32.mrf.mxu2  ;;  %v3865_v35 = vld [vmem:[#allocation3 + $0x44] sm:$0xf] }
 0x6cf   :  { %4074 = vst [vmem:[#allocation2 + $0x28] sm:$0xff] %v4037_v33   ;;  %v3589_v36 = vld [vmem:[#allocation3 + $0x48] sm:$0xf0]  ;;  %v2217_v38 = vadd.f32 %v4427_v61, %v2216_v34 }
 0x6d0   :  { %v3592_v37 = vor.u32 %v3865_v35, %v3589_v36  ;;  %2717 = vmatpush.bf16.msrb.mxu1 %v3877_v22 }
 0x6d1   :  { %v2266_v43 = vadd.f32 %v2265_v27, %v2217_v38  ;;  %v3874_v27 = vld [vmem:[#allocation9 + $0x208] sm:$0xff] }
 0x6d2   :  { %2791 = vmatmul.bf16.gmra.mxu2 %v3592_v37 }
 0x6d3   :  { %v2287_v46 = vmax.f32 %v2266_v43, 0.0 }
 0x6d4   :  { %2718 = vmatpush.bf16.msrb.mxu1 %v3876_v25  ;;  %v4445_v25 = vld [vmem:[#allocation10 + $0x4] ss:$0 sm:$0xff] }
 0x6d6   :  { %v2218_v31 = vpop.f32.mrf.mxu2  ;;  %v2333_v41 = vld [vmem:[#allocation2 + $0x28] sm:$0xf]  ;;  %v2334_v42 = vld [vmem:[#allocation2 + $0x2c] sm:$0xf] }
 0x6d7   :  { %v2219_v44 = vadd.f32 %v4427_v61, %v2218_v31  ;;  %2478 = vst [vmem:[#allocation3 + $0x54] sm:$0xf] %v2333_v41 }
 0x6d8   :  { %2479 = vst [vmem:[#allocation3 + $0x5c] sm:$0xf] %v2334_v42  ;;  %2719 = vmatpush.bf16.msrb.mxu1 %v3875_v26 }
 0x6d9   :  { %v2268_v45 = vadd.f32 %v2267_v40, %v2219_v44 }
 0x6db   :  { %v2288_v47 = vmax.f32 %v2268_v45, 0.0 }
 0x6dc   :  { %2720 = vmatpush.bf16.msrb.mxu1 %v3874_v27 }
 0x6dd   :  { %v4042_v48 = vpack.c.bf16 %v2288_v47, %v2287_v46 }
 0x6de   :  { %v2221_v50 = vpop.f32.mrf.mxu2  ;;  %v3867_v51 = vld [vmem:[#allocation3 + $0x54] sm:$0xf] }
 0x6df   :  { %4075 = vst [vmem:[#allocation2 + $0x30] sm:$0xff] %v4042_v48   ;;  %v3597_v52 = vld [vmem:[#allocation3 + $0x58] sm:$0xf0]  ;;  %v2222_v39 = vadd.f32 %v4427_v61, %v2221_v50 }
 0x6e0   :  { %v3600_v53 = vor.u32 %v3867_v51, %v3597_v52  ;;  %2721 = vmatpush.bf16.msrb.mxu1 %v3873_v28 }
 0x6e1   :  { %v2271_v57 = vadd.f32 %v2270_v49, %v2222_v39 }
 0x6e2   :  { %2796 = vmatmul.bf16.gmra.mxu2 %v3600_v53 }
 0x6e3   :  { %v2289_v59 = vmax.f32 %v2271_v57, 0.0 }
 0x6e6   :  { %v2223_v54 = vpop.f32.mrf.mxu2  ;;  %v2335_v55 = vld [vmem:[#allocation2 + $0x30] sm:$0xf]  ;;  %v2336_v56 = vld [vmem:[#allocation2 + $0x34] sm:$0xf] }
 0x6e7   :  { %v2224_v16 = vadd.f32 %v4427_v61, %v2223_v54  ;;  %2480 = vst [vmem:[#allocation3 + $0x64] sm:$0xf] %v2335_v55  ;;  %v3855_v8 = vld [vmem:[#allocation2 + $0x30] sm:$0xff]  ;;  %v3854_v61 = vld [vmem:[#allocation2 + $0x28] sm:$0xff] }
 0x6e8   :  { %2481 = vst [vmem:[#allocation3 + $0x6c] sm:$0xf] %v2336_v56 }
 0x6e9   :  { %v2273_v18 = vadd.f32 %v2272_v58, %v2224_v16 }
 0x6eb   :  { %v2290_v60 = vmax.f32 %v2273_v18, 0.0 }
 0x6ed   :  { %v4047_v17 = vpack.c.bf16 %v2290_v60, %v2289_v59 }
 0x6ee   :  { %v3869_v19 = vld [vmem:[#allocation3 + $0x64] sm:$0xf] }
 0x6ef   :  { %4076 = vst [vmem:[#allocation2 + $0x38] sm:$0xff] %v4047_v17   ;;  %v3605_v20 = vld [vmem:[#allocation3 + $0x68] sm:$0xf0] }
 0x6f0   :  { %v3608_v5 = vor.u32 %v3869_v19, %v3605_v20 }
 0x6f2   :  { %2801 = vmatmul.bf16.gmra.mxu2 %v3608_v5 }
 0x6f6   :  { %v3856_v30 = vld [vmem:[#allocation2 + $0x38] sm:$0xff] }
 0x6f7   :  { %v2337_v6 = vld [vmem:[#allocation2 + $0x38] sm:$0xf]  ;;  %v2338_v7 = vld [vmem:[#allocation2 + $0x3c] sm:$0xf]  ;;  %2387 = vmatpush.bf16.msrb.mxu0 %v3856_v30 }
 0x6f8   :  { %2482 = vst [vmem:[#allocation3 + $0x74] sm:$0xf] %v2337_v6 }
 0x6f9   :  { %2483 = vst [vmem:[#allocation3 + $0x7c] sm:$0xf] %v2338_v7 }
 0x6fb   :  { %2388 = vmatpush.bf16.msrb.mxu0 %v3855_v8 }
 0x6ff   :  { %v3871_v9 = vld [vmem:[#allocation3 + $0x74] sm:$0xf]  ;;  %2389 = vmatpush.bf16.msrb.mxu0 %v3854_v61 }
 0x700   :  { %v3613_v21 = vld [vmem:[#allocation3 + $0x78] sm:$0xf0] }
 0x701   :  { %v3616_v29 = vor.u32 %v3871_v9, %v3613_v21 }
 0x703   :  { %2806 = vmatmul.bf16.gmra.mxu2 %v3616_v29  ;;  %2390 = vmatpush.bf16.msrb.mxu0 %v3853_v62 }
 0x707   :  { %2391 = vmatpush.bf16.msrb.mxu0 %v3852_v13 }
 0x70b   :  { %2392 = vmatpush.bf16.msrb.mxu0 %v3851_v63 }
 0x70f   :  { %2393 = vmatpush.bf16.msrb.mxu0 %v3850_v0 }
 0x713   :  { %2394 = vmatpush.bf16.msrb.mxu0 %v3849_v1 }
 0x716   :  { %2395 = vmatmul.bf16.vlgmr.msrb.gmra.mxu0 %v4125_v2 }
 0x726   :  { %2400 = vmatmul.bf16.gmra.mxu0 %v4126_v3 }
 0x736   :  { %2405 = vmatmul.bf16.gmra.mxu0 %v4127_v4 }
 0x746   :  { %2410 = vmatmul.bf16.gmra.mxu0 %v4128_v24  ;;  %v2772_v24 = vpop.f32.mrf.mxu2 }
 0x74e   :  { %v2774_v12 = vpop.f32.mrf.mxu2 }
 0x756   :  { %2415 = vmatmul.bf16.gmra.mxu0 %v4129_v10 }
 0x766   :  { %2420 = vmatmul.bf16.gmra.mxu0 %v4130_v11 }
 0x776   :  { %2425 = vmatmul.bf16.gmra.mxu0 %v4131_v23  ;;  %v2777_v23 = vpop.f32.mrf.mxu2 }
 0x77e   :  { %v2779_v28 = vpop.f32.mrf.mxu2 }
 0x786   :  { %2430 = vmatmul.bf16.gmra.mxu0 %v4132_v32 }
 0x793   :  { %v2396_v33 = vpop.f32.mrf.mxu0 }
 0x794   :  { %v2436_v34 = vpack.c.bf16 %v2396_v33, %v2396_v33 }
 0x796   :  { %2452 = vst [vmem:[#allocation3] sm:$0xf] %v2436_v34 }
 0x79b   :  { %v2398_v35 = vpop.f32.mrf.mxu0 }
 0x79c   :  { %v2437_v36 = vpack.c.bf16 %v2398_v35, %v2398_v35 }
 0x79d   :  { %v3555_v40 = vld [vmem:[#allocation3] sm:$0xf] }
 0x79e   :  { %2453 = vst [vmem:[#allocation3 + $0x8] sm:$0xf] %v2437_v36  ;;  %v2782_v36 = vpop.f32.mrf.mxu2 }
 0x7a3   :  { %v2401_v37 = vpop.f32.mrf.mxu0 }
 0x7a4   :  { %v2438_v38 = vpack.c.bf16 %v2401_v37, %v2401_v37 }
 0x7a5   :  { %v3858_v31 = vld [vmem:[#allocation3 + $0x4] sm:$0xf0] }
 0x7a6   :  { %2454 = vst [vmem:[#allocation3 + $0x10] sm:$0xf] %v2438_v38  ;;  %v3556_v41 = vor.u32 %v3858_v31, %v3555_v40  ;;  %v2784_v31 = vpop.f32.mrf.mxu2 }
 0x7a8   :  { %2722 = vmatmul.bf16.vlgmr.msrb.gmra.mxu1 %v3556_v41 }
 0x7ab   :  { %v2403_v42 = vpop.f32.mrf.mxu0 }
 0x7ac   :  { %v2439_v43 = vpack.c.bf16 %v2403_v42, %v2403_v42 }
 0x7ad   :  { %v3563_v46 = vld [vmem:[#allocation3 + $0x10] sm:$0xf] }
 0x7ae   :  { %2455 = vst [vmem:[#allocation3 + $0x18] sm:$0xf] %v2439_v43 }
 0x7b3   :  { %v2406_v44 = vpop.f32.mrf.mxu0 }
 0x7b4   :  { %v2440_v45 = vpack.c.bf16 %v2406_v44, %v2406_v44  ;;  %v2787_v44 = vpop.f32.mrf.mxu2 }
 0x7b5   :  { %v3860_v47 = vld [vmem:[#allocation3 + $0x14] sm:$0xf0] }
 0x7b6   :  { %2456 = vst [vmem:[#allocation3 + $0x20] sm:$0xf] %v2440_v45  ;;  %v3564_v48 = vor.u32 %v3860_v47, %v3563_v46 }
 0x7b8   :  { %2727 = vmatmul.bf16.gmra.mxu1 %v3564_v48 }
 0x7bb   :  { %v2408_v49 = vpop.f32.mrf.mxu0 }
 0x7bc   :  { %v2441_v50 = vpack.c.bf16 %v2408_v49, %v2408_v49 }
 0x7bd   :  { %v3571_v53 = vld [vmem:[#allocation3 + $0x20] sm:$0xf] }
 0x7be   :  { %2457 = vst [vmem:[#allocation3 + $0x28] sm:$0xf] %v2441_v50  ;;  %v2789_v50 = vpop.f32.mrf.mxu2 }
 0x7c3   :  { %v2411_v51 = vpop.f32.mrf.mxu0 }
 0x7c4   :  { %v2442_v52 = vpack.c.bf16 %v2411_v51, %v2411_v51 }
 0x7c5   :  { %v3862_v39 = vld [vmem:[#allocation3 + $0x24] sm:$0xf0] }
 0x7c6   :  { %2458 = vst [vmem:[#allocation3 + $0x30] sm:$0xf] %v2442_v52  ;;  %v3572_v54 = vor.u32 %v3862_v39, %v3571_v53 }
 0x7c8   :  { %2732 = vmatmul.bf16.gmra.mxu1 %v3572_v54  ;;  %v2792_v54 = vpop.f32.mrf.mxu2 }
 0x7cb   :  { %v2413_v55 = vpop.f32.mrf.mxu0 }
 0x7cc   :  { %v2443_v56 = vpack.c.bf16 %v2413_v55, %v2413_v55 }
 0x7cd   :  { %v3579_v58 = vld [vmem:[#allocation3 + $0x30] sm:$0xf] }
 0x7ce   :  { %2459 = vst [vmem:[#allocation3 + $0x38] sm:$0xf] %v2443_v56 }
 0x7d3   :  { %v2416_v57 = vpop.f32.mrf.mxu0 }
 0x7d4   :  { %v2444_v16 = vpack.c.bf16 %v2416_v57, %v2416_v57 }
 0x7d5   :  { %v3864_v18 = vld [vmem:[#allocation3 + $0x34] sm:$0xf0] }
 0x7d6   :  { %2460 = vst [vmem:[#allocation3 + $0x40] sm:$0xf] %v2444_v16  ;;  %v3580_v59 = vor.u32 %v3864_v18, %v3579_v58  ;;  %v2794_v16 = vpop.f32.mrf.mxu2 }
 0x7d8   :  { %2737 = vmatmul.bf16.gmra.mxu1 %v3580_v59 }
 0x7db   :  { %v2418_v60 = vpop.f32.mrf.mxu0 }
 0x7dc   :  { %v2445_v17 = vpack.c.bf16 %v2418_v60, %v2418_v60 }
 0x7dd   :  { %v3587_v5 = vld [vmem:[#allocation3 + $0x40] sm:$0xf] }
 0x7de   :  { %2461 = vst [vmem:[#allocation3 + $0x48] sm:$0xf] %v2445_v17  ;;  %v2797_v60 = vpop.f32.mrf.mxu2 }
 0x7e3   :  { %v2421_v19 = vpop.f32.mrf.mxu0 }
 0x7e4   :  { %v2446_v20 = vpack.c.bf16 %v2421_v19, %v2421_v19 }
 0x7e5   :  { %v3866_v30 = vld [vmem:[#allocation3 + $0x44] sm:$0xf0] }
 0x7e6   :  { %2462 = vst [vmem:[#allocation3 + $0x50] sm:$0xf] %v2446_v20  ;;  %v3588_v6 = vor.u32 %v3866_v30, %v3587_v5 }
 0x7e8   :  { %2742 = vmatmul.bf16.gmra.mxu1 %v3588_v6  ;;  %v2799_v6 = vpop.f32.mrf.mxu2 }
 0x7eb   :  { %v2423_v7 = vpop.f32.mrf.mxu0 }
 0x7ec   :  { %v2447_v8 = vpack.c.bf16 %v2423_v7, %v2423_v7 }
 0x7ed   :  { %v3595_v21 = vld [vmem:[#allocation3 + $0x50] sm:$0xf] }
 0x7ee   :  { %2463 = vst [vmem:[#allocation3 + $0x58] sm:$0xf] %v2447_v8 }
 0x7f3   :  { %v2426_v61 = vpop.f32.mrf.mxu0 }
 0x7f4   :  { %v2448_v9 = vpack.c.bf16 %v2426_v61, %v2426_v61 }
 0x7f5   :  { %v3868_v29 = vld [vmem:[#allocation3 + $0x54] sm:$0xf0] }
 0x7f6   :  { %2464 = vst [vmem:[#allocation3 + $0x60] sm:$0xf] %v2448_v9  ;;  %v3596_v62 = vor.u32 %v3868_v29, %v3595_v21  ;;  %v2802_v21 = vpop.f32.mrf.mxu2 }
 0x7f8   :  { %2747 = vmatmul.bf16.gmra.mxu1 %v3596_v62 }
 0x7fb   :  { %v2428_v13 = vpop.f32.mrf.mxu0 }
 0x7fc   :  { %v2449_v63 = vpack.c.bf16 %v2428_v13, %v2428_v13 }
 0x7fd   :  { %v3603_v2 = vld [vmem:[#allocation3 + $0x60] sm:$0xf] }
 0x7fe   :  { %2465 = vst [vmem:[#allocation3 + $0x68] sm:$0xf] %v2449_v63  ;;  %v2804_v63 = vpop.f32.mrf.mxu2 }
 0x803   :  { %v2431_v0 = vpop.f32.mrf.mxu0 }
 0x804   :  { %v2450_v1 = vpack.c.bf16 %v2431_v0, %v2431_v0 }
 0x805   :  { %v3870_v3 = vld [vmem:[#allocation3 + $0x64] sm:$0xf0] }
 0x806   :  { %2466 = vst [vmem:[#allocation3 + $0x70] sm:$0xf] %v2450_v1  ;;  %v3604_v4 = vor.u32 %v3870_v3, %v3603_v2  ;;  %v2807_v3 = vpop.f32.mrf.mxu2 }
 0x808   :  { %2752 = vmatmul.bf16.gmra.mxu1 %v3604_v4 }
 0x80b   :  { %v2433_v10 = vpop.f32.mrf.mxu0 }
 0x80c   :  { %v2451_v11 = vpack.c.bf16 %v2433_v10, %v2433_v10 }
 0x80d   :  { %v3611_v14 = vld [vmem:[#allocation3 + $0x70] sm:$0xf] }
 0x80e   :  { %2467 = vst [vmem:[#allocation3 + $0x78] sm:$0xf] %v2451_v11 }
 0x815   :  { %v3872_v15 = vld [vmem:[#allocation3 + $0x74] sm:$0xf0] }
 0x816   :  { %v3612_v22 = vor.u32 %v3872_v15, %v3611_v14  ;;  %v2809_v14 = vpop.f32.mrf.mxu2 }
 0x818   :  { %2757 = vmatmul.bf16.gmra.mxu1 %v3612_v22 }
 0x825   :  { %v2723_v26 = vpop.f32.mrf.mxu1 }
 0x826   :  { %v2724_v27 = vadd.f32 %v4445_v25, %v2723_v26 }
 0x828   :  { %v2773_v32 = vadd.f32 %v2772_v24, %v2724_v27 }
 0x82a   :  { %2812 = vst [vmem:[#allocation12] sm:$0xff] %v2773_v32 }
 0x82d   :  { %v2725_v33 = vpop.f32.mrf.mxu1 }
 0x82e   :  { %v2726_v34 = vadd.f32 %v4445_v25, %v2725_v33 }
 0x830   :  { %v2775_v35 = vadd.f32 %v2774_v12, %v2726_v34 }
 0x832   :  { %2813 = vst [vmem:[#allocation12 + $0x8] sm:$0xff] %v2775_v35 }
 0x835   :  { %v2728_v37 = vpop.f32.mrf.mxu1 }
 0x836   :  { %v2729_v38 = vadd.f32 %v4445_v25, %v2728_v37 }
 0x838   :  { %v2778_v40 = vadd.f32 %v2777_v23, %v2729_v38 }
 0x83a   :  { %2814 = vst [vmem:[#allocation12 + $0x10] sm:$0xff] %v2778_v40 }
 0x83d   :  { %v2730_v41 = vpop.f32.mrf.mxu1 }
 0x83e   :  { %v2731_v42 = vadd.f32 %v4445_v25, %v2730_v41 }
 0x840   :  { %v2780_v43 = vadd.f32 %v2779_v28, %v2731_v42 }
 0x842   :  { %2815 = vst [vmem:[#allocation12 + $0x18] sm:$0xff] %v2780_v43 }
 0x845   :  { %v2733_v45 = vpop.f32.mrf.mxu1 }
 0x846   :  { %v2734_v46 = vadd.f32 %v4445_v25, %v2733_v45 }
 0x848   :  { %v2783_v47 = vadd.f32 %v2782_v36, %v2734_v46 }
 0x84a   :  { %2816 = vst [vmem:[#allocation12 + $0x20] sm:$0xff] %v2783_v47 }
 0x84d   :  { %v2735_v48 = vpop.f32.mrf.mxu1 }
 0x84e   :  { %v2736_v49 = vadd.f32 %v4445_v25, %v2735_v48 }
 0x850   :  { %v2785_v51 = vadd.f32 %v2784_v31, %v2736_v49 }
 0x852   :  { %2817 = vst [vmem:[#allocation12 + $0x28] sm:$0xff] %v2785_v51 }
 0x855   :  { %v2738_v52 = vpop.f32.mrf.mxu1 }
 0x856   :  { %v2739_v53 = vadd.f32 %v4445_v25, %v2738_v52 }
 0x858   :  { %v2788_v39 = vadd.f32 %v2787_v44, %v2739_v53 }
 0x85a   :  { %2818 = vst [vmem:[#allocation12 + $0x30] sm:$0xff] %v2788_v39 }
 0x85d   :  { %v2740_v55 = vpop.f32.mrf.mxu1 }
 0x85e   :  { %v2741_v56 = vadd.f32 %v4445_v25, %v2740_v55 }
 0x860   :  { %v2790_v57 = vadd.f32 %v2789_v50, %v2741_v56 }
 0x862   :  { %2819 = vst [vmem:[#allocation12 + $0x38] sm:$0xff] %v2790_v57 }
 0x865   :  { %v2743_v58 = vpop.f32.mrf.mxu1 }
 0x866   :  { %v2744_v18 = vadd.f32 %v4445_v25, %v2743_v58 }
 0x868   :  { %v2793_v59 = vadd.f32 %v2792_v54, %v2744_v18 }
 0x86a   :  { %2820 = vst [vmem:[#allocation12 + $0x40] sm:$0xff] %v2793_v59 }
 0x86d   :  { %v2745_v17 = vpop.f32.mrf.mxu1 }
 0x86e   :  { %v2746_v19 = vadd.f32 %v4445_v25, %v2745_v17 }
 0x870   :  { %v2795_v20 = vadd.f32 %v2794_v16, %v2746_v19 }
 0x872   :  { %2821 = vst [vmem:[#allocation12 + $0x48] sm:$0xff] %v2795_v20 }
 0x875   :  { %v2748_v5 = vpop.f32.mrf.mxu1 }
 0x876   :  { %v2749_v30 = vadd.f32 %v4445_v25, %v2748_v5 }
 0x878   :  { %v2798_v7 = vadd.f32 %v2797_v60, %v2749_v30 }
 0x87a   :  { %2822 = vst [vmem:[#allocation12 + $0x50] sm:$0xff] %v2798_v7 }
 0x87d   :  { %v2750_v8 = vpop.f32.mrf.mxu1 }
 0x87e   :  { %v2751_v61 = vadd.f32 %v4445_v25, %v2750_v8 }
 0x880   :  { %v2800_v9 = vadd.f32 %v2799_v6, %v2751_v61 }
 0x882   :  { %2823 = vst [vmem:[#allocation12 + $0x58] sm:$0xff] %v2800_v9 }
 0x885   :  { %v2753_v29 = vpop.f32.mrf.mxu1 }
 0x886   :  { %v2754_v62 = vadd.f32 %v4445_v25, %v2753_v29 }
 0x888   :  { %v2803_v13 = vadd.f32 %v2802_v21, %v2754_v62 }
 0x88a   :  { %2824 = vst [vmem:[#allocation12 + $0x60] sm:$0xff] %v2803_v13 }
 0x88d   :  { %v2755_v0 = vpop.f32.mrf.mxu1 }
 0x88e   :  { %v2756_v1 = vadd.f32 %v4445_v25, %v2755_v0 }
 0x890   :  { %v2805_v2 = vadd.f32 %v2804_v63, %v2756_v1 }
 0x892   :  { %2825 = vst [vmem:[#allocation12 + $0x68] sm:$0xff] %v2805_v2 }
 0x895   :  { %v2758_v4 = vpop.f32.mrf.mxu1 }
 0x896   :  { %v2759_v24 = vadd.f32 %v4445_v25, %v2758_v4 }
 0x898   :  { %v2808_v10 = vadd.f32 %v2807_v3, %v2759_v24 }
 0x89a   :  { %2826 = vst [vmem:[#allocation12 + $0x70] sm:$0xff] %v2808_v10 }
 0x89d   :  { %v2760_v11 = vpop.f32.mrf.mxu1 }
 0x89e   :  { %v2761_v12 = vadd.f32 %v4445_v25, %v2760_v11 }
 0x8a0   :  { %v2810_v15 = vadd.f32 %v2809_v14, %v2761_v12 }
 0x8a2   :  { %2827 = vst [vmem:[#allocation12 + $0x78] sm:$0xff] %v2810_v15 }
 0x8a3   :  { %2840 = dma.vmem_to_hbm [thread:$0]  %s2833_s3, 2048, %s2835_s13, [#allocation6], %s4270_s14, %s4270_s14, %s4271_s15  }
 0x8a4   :  { %4259 = dma.done.wait [#allocation6], 2048  }
 0x8a5   :  { %4260 = vsyncadd [#allocation6], 4294965248 }
 0x8a6   :  { %2845 = vsyncpa [#allocation5], 1 }
 0x8a7   :  { %2846 = vsyncpa [#allocation8], 1 }
 0x8a8   :  { %2847 = vsyncpa [#allocation11], 1 }
 0x8a9   :  { %2848 = vsyncpa [#allocation6], 1 }

</bundles_post_ra>
